<compile_context>
chip_gen: v6e
topology: v6e:2x2x1
jax: 0.10.0
libtpu: 0.0.40
codegen_flags: <defaults>
</compile_context>

<pallas_src>
import jax
import jax.numpy as jnp
from jax.experimental import pallas as pl
from jax.experimental.pallas import tpu as pltpu


# ------------------------------ fused kernel ---------------------------------
def make_model3_kernel(num_layers):
    """Builds a kernel: refs = [x2d, (w_ih, w_hh, bias)*num_layers, fc_w, fc_b, out]."""

    def kernel(*refs):
        x_ref = refs[0]                               # (B*T, I)  batch-major rows
        layer_refs = refs[1:1 + 3 * num_layers]
        fcw_ref = refs[1 + 3 * num_layers]            # (H, C)
        fcb_ref = refs[2 + 3 * num_layers]            # (1, C)
        out_ref = refs[3 + 3 * num_layers]            # (B, C)

        B = out_ref.shape[0]
        T = x_ref.shape[0] // B
        H = fcw_ref.shape[0]
        G = 4 * H
        L = num_layers

        # Loop-invariant weights / biases, loaded once into vregs.
        wih = [layer_refs[3 * l][...] for l in range(L)]        # (in_dim, 4H)
        whh = [layer_refs[3 * l + 1][...] for l in range(L)]    # (H, 4H)
        bias = [layer_refs[3 * l + 2][...] for l in range(L)]   # (1, 4H) = b_ih+b_hh

        # Hoisted per-lane activation scale/shift implementing, in ONE tanh
        # (EUP) pass over the full (B, 4H) gate slab:
        #   i/f/o bands:  sigmoid(z) = 0.5 * (1 + tanh(0.5 * z))
        #   g band:       tanh(z)
        lane = jax.lax.broadcasted_iota(jnp.int32, (B, G), 1)
        is_g = (lane >= 2 * H) & (lane < 3 * H)
        act_scale = jnp.where(is_g, 1.0, 0.5)          # (B, 4H) f32
        act_shift = jnp.where(is_g, 0.0, 0.5)          # (B, 4H) f32

        # Deeper-layer biases pre-broadcast ONCE (not 16x inside the loop).
        bias_b = [None] + [jnp.broadcast_to(bias[l], (B, G)) for l in range(1, L)]

        # Layer-0 input projection for ALL time steps in one MXU call, bias
        # folded in.  (B*T, 4H) -> (B, T, 4H) keeps the minor (8,128) tiling.
        xg0 = (
            jnp.dot(x_ref[...], wih[0], preferred_element_type=jnp.float32)
            + bias[0]
        ).reshape(B, T, G)

        def cell(gates_in, h_prev, c_prev, w_hh):
            # gates_in already contains input projection + combined bias.
            gates = gates_in + jnp.dot(
                h_prev, w_hh, preferred_element_type=jnp.float32)
            th = jnp.tanh(gates * act_scale)           # single EUP pass
            act = th * act_scale + act_shift           # [sig(i),sig(f),tanh(g),sig(o)]
            i_g = act[:, 0 * H:1 * H]
            f_g = act[:, 1 * H:2 * H]
            g_g = act[:, 2 * H:3 * H]
            o_g = act[:, 3 * H:4 * H]
            c_new = f_g * c_prev + i_g * g_g
            h_new = o_g * jnp.tanh(c_new)
            return h_new, c_new

        # Zero-initialized carried states (h0/c0 == 0 in the PyTorch forward).
        hs = [jnp.zeros((B, H), jnp.float32) for _ in range(L)]
        cs = [jnp.zeros((B, H), jnp.float32) for _ in range(L)]

        # Wavefront (skewed) schedule over (t, l).  Cells on the same
        # anti-diagonal d = t + l are independent, so two MXU/EUP chains are
        # in flight per diagonal.  Descending l within a diagonal guarantees
        # hs[l-1] still holds step t (the value layer l needs) when read.
        for d in range(T + L - 1):
            l_hi = min(L - 1, d)
            l_lo = max(0, d - (T - 1))
            for l in range(l_hi, l_lo - 1, -1):
                t = d - l
                if l == 0:
                    gates_in = xg0[:, t, :]
                else:
                    # x-part of layer l: off this layer's recurrent chain.
                    gates_in = (
                        jnp.dot(hs[l - 1], wih[l],
                                preferred_element_type=jnp.float32)
                        + bias_b[l]
                    )
                hs[l], cs[l] = cell(gates_in, hs[l], cs[l], whh[l])

        # Fused FC head on the last layer's final hidden state (== out[:, -1, :]).
        out_ref[...] = (
            jnp.dot(hs[L - 1], fcw_ref[...], preferred_element_type=jnp.float32)
            + fcb_ref[...]
        )

    return kernel


# ------------------------------- Model3 forward --------------------------------
@jax.jit
def model3_forward(x, lstm_params, fc_w, fc_b):
    """x: (B, T, input_size). lstm_params: list of (w_ih, w_hh, b_ih, b_hh)."""
    B, T, I = x.shape
    C = fc_w.shape[0]
    num_layers = len(lstm_params)

    # Free, layout-preserving reshape (NO transpose op before the kernel).
    x2d = jnp.reshape(x, (B * T, I))

    args = [x2d]
    for (w_ih, w_hh, b_ih, b_hh) in lstm_params:
        args += [w_ih.T, w_hh.T, (b_ih + b_hh)[None, :]]   # (in,4H), (H,4H), (1,4H)
    args += [fc_w.T, fc_b[None, :]]                        # (H, C), (1, C)

    # No grid: all operands resident in VMEM for the single kernel invocation.
    return pl.pallas_call(
        make_model3_kernel(num_layers),
        out_shape=jax.ShapeDtypeStruct((B, C), jnp.float32),
        in_specs=[pl.BlockSpec(memory_space=pltpu.MemorySpace.VMEM)
                  for _ in args],
        out_specs=pl.BlockSpec(memory_space=pltpu.MemorySpace.VMEM),
    )(*args)


# ----------------------------- pure-JAX reference ------------------------------
def model3_ref(x, lstm_params, fc_w, fc_b):
    B = x.shape[0]
    h_seq = x
    for (w_ih, w_hh, b_ih, b_hh) in lstm_params:
        H = w_hh.shape[1]

        def step(carry, xt):
            h, c = carry
            gates = xt @ w_ih.T + h @ w_hh.T + b_ih + b_hh
            i, f, g, o = jnp.split(gates, 4, axis=-1)
            i = jax.nn.sigmoid(i)
            f = jax.nn.sigmoid(f)
            g = jnp.tanh(g)
            o = jax.nn.sigmoid(o)
            c = f * c + i * g
            h = o * jnp.tanh(c)
            return (h, c), h

        carry0 = (jnp.zeros((B, H), jnp.float32), jnp.zeros((B, H), jnp.float32))
        _, hs = jax.lax.scan(step, carry0, jnp.swapaxes(h_seq, 0, 1))
        h_seq = jnp.swapaxes(hs, 0, 1)
    return h_seq[:, -1, :] @ fc_w.T + fc_b


# ------------------------------------ main -------------------------------------
if __name__ == "__main__":
    B, T = 2, 8
    input_size, hidden_size, num_layers, num_classes = 16, 32, 2, 8

    key = jax.random.PRNGKey(0)
    k_bound = 1.0 / (hidden_size ** 0.5)

    lstm_params = []
    for layer in range(num_layers):
        in_dim = input_size if layer == 0 else hidden_size
        key, k1, k2, k3, k4 = jax.random.split(key, 5)
        w_ih = jax.random.uniform(k1, (4 * hidden_size, in_dim), jnp.float32,
                                  -k_bound, k_bound)
        w_hh = jax.random.uniform(k2, (4 * hidden_size, hidden_size), jnp.float32,
                                  -k_bound, k_bound)
        b_ih = jax.random.uniform(k3, (4 * hidden_size,), jnp.float32,
                                  -k_bound, k_bound)
        b_hh = jax.random.uniform(k4, (4 * hidden_size,), jnp.float32,
                                  -k_bound, k_bound)
        lstm_params.append((w_ih, w_hh, b_ih, b_hh))

    key, k5, k6, kx = jax.random.split(key, 4)
    fc_w = jax.random.uniform(k5, (num_classes, hidden_size), jnp.float32,
                              -k_bound, k_bound)
    fc_b = jax.random.uniform(k6, (num_classes,), jnp.float32, -k_bound, k_bound)

    x = jax.random.normal(kx, (B, T, input_size), jnp.float32)

    out = jax.block_until_ready(model3_forward(x, lstm_params, fc_w, fc_b))
    ref = jax.block_until_ready(model3_ref(x, lstm_params, fc_w, fc_b))

    assert out.shape == (B, num_classes)
    assert jnp.allclose(out, ref, atol=2e-3, rtol=2e-3), (out, ref)

    print("KERNEL_OK")
</pallas_src>

<mosaic_0001>
module attributes {stable_mosaic.version = 11 : i64} {
  func.func @kernel(%arg0: memref<16x16xf32, #tpu.memory_space<vmem>>, %arg1: memref<16x128xf32, #tpu.memory_space<vmem>>, %arg2: memref<32x128xf32, #tpu.memory_space<vmem>>, %arg3: memref<1x128xf32, #tpu.memory_space<vmem>>, %arg4: memref<32x128xf32, #tpu.memory_space<vmem>>, %arg5: memref<32x128xf32, #tpu.memory_space<vmem>>, %arg6: memref<1x128xf32, #tpu.memory_space<vmem>>, %arg7: memref<32x8xf32, #tpu.memory_space<vmem>>, %arg8: memref<1x8xf32, #tpu.memory_space<vmem>>, %arg9: memref<2x8xf32, #tpu.memory_space<vmem>>) attributes {dimension_semantics = [], scalar_prefetch = 0 : i64, scratch_operands = 0 : i64, tpu.core_type = #tpu.core_type<tc>} {
    %c0 = arith.constant 0 : index
    %c0_0 = arith.constant 0 : index
    %0 = vector.load %arg1[%c0, %c0_0] : memref<16x128xf32, #tpu.memory_space<vmem>>, vector<16x128xf32>
    %c0_1 = arith.constant 0 : index
    %c0_2 = arith.constant 0 : index
    %1 = vector.load %arg4[%c0_1, %c0_2] : memref<32x128xf32, #tpu.memory_space<vmem>>, vector<32x128xf32>
    %c0_3 = arith.constant 0 : index
    %c0_4 = arith.constant 0 : index
    %2 = vector.load %arg2[%c0_3, %c0_4] : memref<32x128xf32, #tpu.memory_space<vmem>>, vector<32x128xf32>
    %c0_5 = arith.constant 0 : index
    %c0_6 = arith.constant 0 : index
    %3 = vector.load %arg5[%c0_5, %c0_6] : memref<32x128xf32, #tpu.memory_space<vmem>>, vector<32x128xf32>
    %c0_7 = arith.constant 0 : index
    %c0_8 = arith.constant 0 : index
    %4 = vector.load %arg3[%c0_7, %c0_8] : memref<1x128xf32, #tpu.memory_space<vmem>>, vector<1x128xf32>
    %c0_9 = arith.constant 0 : index
    %c0_10 = arith.constant 0 : index
    %5 = vector.load %arg6[%c0_9, %c0_10] : memref<1x128xf32, #tpu.memory_space<vmem>>, vector<1x128xf32>
    %6 = tpu.iota {dimensions = array<i32: 1>} : vector<2x128xi32>
    %c64_i32 = arith.constant 64 : i32
    %7 = vector.broadcast %c64_i32 : i32 to vector<2x128xi32>
    %8 = arith.cmpi sge, %6, %7 : vector<2x128xi32>
    %c96_i32 = arith.constant 96 : i32
    %9 = vector.broadcast %c96_i32 : i32 to vector<2x128xi32>
    %10 = arith.cmpi slt, %6, %9 : vector<2x128xi32>
    %11 = arith.andi %8, %10 : vector<2x128xi1>
    %cst = arith.constant 1.000000e+00 : f32
    %cst_11 = arith.constant 5.000000e-01 : f32
    %12 = vector.broadcast %cst : f32 to vector<2x128xf32>
    %13 = vector.broadcast %cst_11 : f32 to vector<2x128xf32>
    %14 = arith.select %11, %12, %13 : vector<2x128xi1>, vector<2x128xf32>
    %cst_12 = arith.constant 0.000000e+00 : f32
    %cst_13 = arith.constant 5.000000e-01 : f32
    %15 = vector.broadcast %cst_12 : f32 to vector<2x128xf32>
    %16 = vector.broadcast %cst_13 : f32 to vector<2x128xf32>
    %17 = arith.select %11, %15, %16 : vector<2x128xi1>, vector<2x128xf32>
    %18 = vector.shape_cast %5 : vector<1x128xf32> to vector<1x128xf32>
    %19 = vector.broadcast %18 : vector<1x128xf32> to vector<2x128xf32>
    %c0_14 = arith.constant 0 : index
    %c0_15 = arith.constant 0 : index
    %20 = vector.load %arg0[%c0_14, %c0_15] : memref<16x16xf32, #tpu.memory_space<vmem>>, vector<16x16xf32>
    %cst_16 = arith.constant dense<0.000000e+00> : vector<16x128xf32>
    %21 = tpu.matmul %20, %0, %cst_16 {dimension_numbers = #tpu.dot_dimension_numbers<[1], [0], [0], [1], [0, 0, 1, 1], [], []>} : vector<16x16xf32>, vector<16x128xf32>, vector<16x128xf32> -> vector<16x128xf32>
    %22 = vector.broadcast %4 : vector<1x128xf32> to vector<16x128xf32>
    %23 = arith.addf %21, %22 : vector<16x128xf32>
    %24 = vector.shape_cast %23 : vector<16x128xf32> to vector<2x8x128xf32>
    %cst_17 = arith.constant 0.000000e+00 : f32
    %25 = vector.broadcast %cst_17 : f32 to vector<2x32xf32>
    %cst_18 = arith.constant 0.000000e+00 : f32
    %26 = vector.broadcast %cst_18 : f32 to vector<2x32xf32>
    %cst_19 = arith.constant 0.000000e+00 : f32
    %27 = vector.broadcast %cst_19 : f32 to vector<2x32xf32>
    %cst_20 = arith.constant 0.000000e+00 : f32
    %28 = vector.broadcast %cst_20 : f32 to vector<2x32xf32>
    %29 = vector.extract_strided_slice %24 {offsets = [0, 0, 0], sizes = [2, 1, 128], strides = [1, 1, 1]} : vector<2x8x128xf32> to vector<2x1x128xf32>
    %30 = vector.shape_cast %29 : vector<2x1x128xf32> to vector<2x128xf32>
    %cst_21 = arith.constant dense<0.000000e+00> : vector<2x128xf32>
    %31 = tpu.matmul %25, %2, %cst_21 {dimension_numbers = #tpu.dot_dimension_numbers<[1], [0], [0], [1], [0, 0, 1, 1], [], []>} : vector<2x32xf32>, vector<32x128xf32>, vector<2x128xf32> -> vector<2x128xf32>
    %32 = arith.addf %30, %31 : vector<2x128xf32>
    %33 = arith.mulf %32, %14 : vector<2x128xf32>
    %34 = math.tanh %33 : vector<2x128xf32>
    %35 = arith.mulf %34, %14 : vector<2x128xf32>
    %36 = arith.addf %35, %17 : vector<2x128xf32>
    %37 = vector.extract_strided_slice %36 {offsets = [0, 0], sizes = [2, 32], strides = [1, 1]} : vector<2x128xf32> to vector<2x32xf32>
    %38 = vector.extract_strided_slice %36 {offsets = [0, 32], sizes = [2, 32], strides = [1, 1]} : vector<2x128xf32> to vector<2x32xf32>
    %39 = vector.extract_strided_slice %36 {offsets = [0, 64], sizes = [2, 32], strides = [1, 1]} : vector<2x128xf32> to vector<2x32xf32>
    %40 = vector.extract_strided_slice %36 {offsets = [0, 96], sizes = [2, 32], strides = [1, 1]} : vector<2x128xf32> to vector<2x32xf32>
    %41 = arith.mulf %38, %27 : vector<2x32xf32>
    %42 = arith.mulf %37, %39 : vector<2x32xf32>
    %43 = arith.addf %41, %42 : vector<2x32xf32>
    %44 = math.tanh %43 : vector<2x32xf32>
    %45 = arith.mulf %40, %44 : vector<2x32xf32>
    %cst_22 = arith.constant dense<0.000000e+00> : vector<2x128xf32>
    %46 = tpu.matmul %45, %1, %cst_22 {dimension_numbers = #tpu.dot_dimension_numbers<[1], [0], [0], [1], [0, 0, 1, 1], [], []>} : vector<2x32xf32>, vector<32x128xf32>, vector<2x128xf32> -> vector<2x128xf32>
    %47 = arith.addf %46, %19 : vector<2x128xf32>
    %cst_23 = arith.constant dense<0.000000e+00> : vector<2x128xf32>
    %48 = tpu.matmul %26, %3, %cst_23 {dimension_numbers = #tpu.dot_dimension_numbers<[1], [0], [0], [1], [0, 0, 1, 1], [], []>} : vector<2x32xf32>, vector<32x128xf32>, vector<2x128xf32> -> vector<2x128xf32>
    %49 = arith.addf %47, %48 : vector<2x128xf32>
    %50 = arith.mulf %49, %14 : vector<2x128xf32>
    %51 = math.tanh %50 : vector<2x128xf32>
    %52 = arith.mulf %51, %14 : vector<2x128xf32>
    %53 = arith.addf %52, %17 : vector<2x128xf32>
    %54 = vector.extract_strided_slice %53 {offsets = [0, 0], sizes = [2, 32], strides = [1, 1]} : vector<2x128xf32> to vector<2x32xf32>
    %55 = vector.extract_strided_slice %53 {offsets = [0, 32], sizes = [2, 32], strides = [1, 1]} : vector<2x128xf32> to vector<2x32xf32>
    %56 = vector.extract_strided_slice %53 {offsets = [0, 64], sizes = [2, 32], strides = [1, 1]} : vector<2x128xf32> to vector<2x32xf32>
    %57 = vector.extract_strided_slice %53 {offsets = [0, 96], sizes = [2, 32], strides = [1, 1]} : vector<2x128xf32> to vector<2x32xf32>
    %58 = arith.mulf %55, %28 : vector<2x32xf32>
    %59 = arith.mulf %54, %56 : vector<2x32xf32>
    %60 = arith.addf %58, %59 : vector<2x32xf32>
    %61 = math.tanh %60 : vector<2x32xf32>
    %62 = arith.mulf %57, %61 : vector<2x32xf32>
    %63 = vector.extract_strided_slice %24 {offsets = [0, 1, 0], sizes = [2, 1, 128], strides = [1, 1, 1]} : vector<2x8x128xf32> to vector<2x1x128xf32>
    %64 = vector.shape_cast %63 : vector<2x1x128xf32> to vector<2x128xf32>
    %cst_24 = arith.constant dense<0.000000e+00> : vector<2x128xf32>
    %65 = tpu.matmul %45, %2, %cst_24 {dimension_numbers = #tpu.dot_dimension_numbers<[1], [0], [0], [1], [0, 0, 1, 1], [], []>} : vector<2x32xf32>, vector<32x128xf32>, vector<2x128xf32> -> vector<2x128xf32>
    %66 = arith.addf %64, %65 : vector<2x128xf32>
    %67 = arith.mulf %66, %14 : vector<2x128xf32>
    %68 = math.tanh %67 : vector<2x128xf32>
    %69 = arith.mulf %68, %14 : vector<2x128xf32>
    %70 = arith.addf %69, %17 : vector<2x128xf32>
    %71 = vector.extract_strided_slice %70 {offsets = [0, 0], sizes = [2, 32], strides = [1, 1]} : vector<2x128xf32> to vector<2x32xf32>
    %72 = vector.extract_strided_slice %70 {offsets = [0, 32], sizes = [2, 32], strides = [1, 1]} : vector<2x128xf32> to vector<2x32xf32>
    %73 = vector.extract_strided_slice %70 {offsets = [0, 64], sizes = [2, 32], strides = [1, 1]} : vector<2x128xf32> to vector<2x32xf32>
    %74 = vector.extract_strided_slice %70 {offsets = [0, 96], sizes = [2, 32], strides = [1, 1]} : vector<2x128xf32> to vector<2x32xf32>
    %75 = arith.mulf %72, %43 : vector<2x32xf32>
    %76 = arith.mulf %71, %73 : vector<2x32xf32>
    %77 = arith.addf %75, %76 : vector<2x32xf32>
    %78 = math.tanh %77 : vector<2x32xf32>
    %79 = arith.mulf %74, %78 : vector<2x32xf32>
    %cst_25 = arith.constant dense<0.000000e+00> : vector<2x128xf32>
    %80 = tpu.matmul %79, %1, %cst_25 {dimension_numbers = #tpu.dot_dimension_numbers<[1], [0], [0], [1], [0, 0, 1, 1], [], []>} : vector<2x32xf32>, vector<32x128xf32>, vector<2x128xf32> -> vector<2x128xf32>
    %81 = arith.addf %80, %19 : vector<2x128xf32>
    %cst_26 = arith.constant dense<0.000000e+00> : vector<2x128xf32>
    %82 = tpu.matmul %62, %3, %cst_26 {dimension_numbers = #tpu.dot_dimension_numbers<[1], [0], [0], [1], [0, 0, 1, 1], [], []>} : vector<2x32xf32>, vector<32x128xf32>, vector<2x128xf32> -> vector<2x128xf32>
    %83 = arith.addf %81, %82 : vector<2x128xf32>
    %84 = arith.mulf %83, %14 : vector<2x128xf32>
    %85 = math.tanh %84 : vector<2x128xf32>
    %86 = arith.mulf %85, %14 : vector<2x128xf32>
    %87 = arith.addf %86, %17 : vector<2x128xf32>
    %88 = vector.extract_strided_slice %87 {offsets = [0, 0], sizes = [2, 32], strides = [1, 1]} : vector<2x128xf32> to vector<2x32xf32>
    %89 = vector.extract_strided_slice %87 {offsets = [0, 32], sizes = [2, 32], strides = [1, 1]} : vector<2x128xf32> to vector<2x32xf32>
    %90 = vector.extract_strided_slice %87 {offsets = [0, 64], sizes = [2, 32], strides = [1, 1]} : vector<2x128xf32> to vector<2x32xf32>
    %91 = vector.extract_strided_slice %87 {offsets = [0, 96], sizes = [2, 32], strides = [1, 1]} : vector<2x128xf32> to vector<2x32xf32>
    %92 = arith.mulf %89, %60 : vector<2x32xf32>
    %93 = arith.mulf %88, %90 : vector<2x32xf32>
    %94 = arith.addf %92, %93 : vector<2x32xf32>
    %95 = math.tanh %94 : vector<2x32xf32>
    %96 = arith.mulf %91, %95 : vector<2x32xf32>
    %97 = vector.extract_strided_slice %24 {offsets = [0, 2, 0], sizes = [2, 1, 128], strides = [1, 1, 1]} : vector<2x8x128xf32> to vector<2x1x128xf32>
    %98 = vector.shape_cast %97 : vector<2x1x128xf32> to vector<2x128xf32>
    %cst_27 = arith.constant dense<0.000000e+00> : vector<2x128xf32>
    %99 = tpu.matmul %79, %2, %cst_27 {dimension_numbers = #tpu.dot_dimension_numbers<[1], [0], [0], [1], [0, 0, 1, 1], [], []>} : vector<2x32xf32>, vector<32x128xf32>, vector<2x128xf32> -> vector<2x128xf32>
    %100 = arith.addf %98, %99 : vector<2x128xf32>
    %101 = arith.mulf %100, %14 : vector<2x128xf32>
    %102 = math.tanh %101 : vector<2x128xf32>
    %103 = arith.mulf %102, %14 : vector<2x128xf32>
    %104 = arith.addf %103, %17 : vector<2x128xf32>
    %105 = vector.extract_strided_slice %104 {offsets = [0, 0], sizes = [2, 32], strides = [1, 1]} : vector<2x128xf32> to vector<2x32xf32>
    %106 = vector.extract_strided_slice %104 {offsets = [0, 32], sizes = [2, 32], strides = [1, 1]} : vector<2x128xf32> to vector<2x32xf32>
    %107 = vector.extract_strided_slice %104 {offsets = [0, 64], sizes = [2, 32], strides = [1, 1]} : vector<2x128xf32> to vector<2x32xf32>
    %108 = vector.extract_strided_slice %104 {offsets = [0, 96], sizes = [2, 32], strides = [1, 1]} : vector<2x128xf32> to vector<2x32xf32>
    %109 = arith.mulf %106, %77 : vector<2x32xf32>
    %110 = arith.mulf %105, %107 : vector<2x32xf32>
    %111 = arith.addf %109, %110 : vector<2x32xf32>
    %112 = math.tanh %111 : vector<2x32xf32>
    %113 = arith.mulf %108, %112 : vector<2x32xf32>
    %cst_28 = arith.constant dense<0.000000e+00> : vector<2x128xf32>
    %114 = tpu.matmul %113, %1, %cst_28 {dimension_numbers = #tpu.dot_dimension_numbers<[1], [0], [0], [1], [0, 0, 1, 1], [], []>} : vector<2x32xf32>, vector<32x128xf32>, vector<2x128xf32> -> vector<2x128xf32>
    %115 = arith.addf %114, %19 : vector<2x128xf32>
    %cst_29 = arith.constant dense<0.000000e+00> : vector<2x128xf32>
    %116 = tpu.matmul %96, %3, %cst_29 {dimension_numbers = #tpu.dot_dimension_numbers<[1], [0], [0], [1], [0, 0, 1, 1], [], []>} : vector<2x32xf32>, vector<32x128xf32>, vector<2x128xf32> -> vector<2x128xf32>
    %117 = arith.addf %115, %116 : vector<2x128xf32>
    %118 = arith.mulf %117, %14 : vector<2x128xf32>
    %119 = math.tanh %118 : vector<2x128xf32>
    %120 = arith.mulf %119, %14 : vector<2x128xf32>
    %121 = arith.addf %120, %17 : vector<2x128xf32>
    %122 = vector.extract_strided_slice %121 {offsets = [0, 0], sizes = [2, 32], strides = [1, 1]} : vector<2x128xf32> to vector<2x32xf32>
    %123 = vector.extract_strided_slice %121 {offsets = [0, 32], sizes = [2, 32], strides = [1, 1]} : vector<2x128xf32> to vector<2x32xf32>
    %124 = vector.extract_strided_slice %121 {offsets = [0, 64], sizes = [2, 32], strides = [1, 1]} : vector<2x128xf32> to vector<2x32xf32>
    %125 = vector.extract_strided_slice %121 {offsets = [0, 96], sizes = [2, 32], strides = [1, 1]} : vector<2x128xf32> to vector<2x32xf32>
    %126 = arith.mulf %123, %94 : vector<2x32xf32>
    %127 = arith.mulf %122, %124 : vector<2x32xf32>
    %128 = arith.addf %126, %127 : vector<2x32xf32>
    %129 = math.tanh %128 : vector<2x32xf32>
    %130 = arith.mulf %125, %129 : vector<2x32xf32>
    %131 = vector.extract_strided_slice %24 {offsets = [0, 3, 0], sizes = [2, 1, 128], strides = [1, 1, 1]} : vector<2x8x128xf32> to vector<2x1x128xf32>
    %132 = vector.shape_cast %131 : vector<2x1x128xf32> to vector<2x128xf32>
    %cst_30 = arith.constant dense<0.000000e+00> : vector<2x128xf32>
    %133 = tpu.matmul %113, %2, %cst_30 {dimension_numbers = #tpu.dot_dimension_numbers<[1], [0], [0], [1], [0, 0, 1, 1], [], []>} : vector<2x32xf32>, vector<32x128xf32>, vector<2x128xf32> -> vector<2x128xf32>
    %134 = arith.addf %132, %133 : vector<2x128xf32>
    %135 = arith.mulf %134, %14 : vector<2x128xf32>
    %136 = math.tanh %135 : vector<2x128xf32>
    %137 = arith.mulf %136, %14 : vector<2x128xf32>
    %138 = arith.addf %137, %17 : vector<2x128xf32>
    %139 = vector.extract_strided_slice %138 {offsets = [0, 0], sizes = [2, 32], strides = [1, 1]} : vector<2x128xf32> to vector<2x32xf32>
    %140 = vector.extract_strided_slice %138 {offsets = [0, 32], sizes = [2, 32], strides = [1, 1]} : vector<2x128xf32> to vector<2x32xf32>
    %141 = vector.extract_strided_slice %138 {offsets = [0, 64], sizes = [2, 32], strides = [1, 1]} : vector<2x128xf32> to vector<2x32xf32>
    %142 = vector.extract_strided_slice %138 {offsets = [0, 96], sizes = [2, 32], strides = [1, 1]} : vector<2x128xf32> to vector<2x32xf32>
    %143 = arith.mulf %140, %111 : vector<2x32xf32>
    %144 = arith.mulf %139, %141 : vector<2x32xf32>
    %145 = arith.addf %143, %144 : vector<2x32xf32>
    %146 = math.tanh %145 : vector<2x32xf32>
    %147 = arith.mulf %142, %146 : vector<2x32xf32>
    %cst_31 = arith.constant dense<0.000000e+00> : vector<2x128xf32>
    %148 = tpu.matmul %147, %1, %cst_31 {dimension_numbers = #tpu.dot_dimension_numbers<[1], [0], [0], [1], [0, 0, 1, 1], [], []>} : vector<2x32xf32>, vector<32x128xf32>, vector<2x128xf32> -> vector<2x128xf32>
    %149 = arith.addf %148, %19 : vector<2x128xf32>
    %cst_32 = arith.constant dense<0.000000e+00> : vector<2x128xf32>
    %150 = tpu.matmul %130, %3, %cst_32 {dimension_numbers = #tpu.dot_dimension_numbers<[1], [0], [0], [1], [0, 0, 1, 1], [], []>} : vector<2x32xf32>, vector<32x128xf32>, vector<2x128xf32> -> vector<2x128xf32>
    %151 = arith.addf %149, %150 : vector<2x128xf32>
    %152 = arith.mulf %151, %14 : vector<2x128xf32>
    %153 = math.tanh %152 : vector<2x128xf32>
    %154 = arith.mulf %153, %14 : vector<2x128xf32>
    %155 = arith.addf %154, %17 : vector<2x128xf32>
    %156 = vector.extract_strided_slice %155 {offsets = [0, 0], sizes = [2, 32], strides = [1, 1]} : vector<2x128xf32> to vector<2x32xf32>
    %157 = vector.extract_strided_slice %155 {offsets = [0, 32], sizes = [2, 32], strides = [1, 1]} : vector<2x128xf32> to vector<2x32xf32>
    %158 = vector.extract_strided_slice %155 {offsets = [0, 64], sizes = [2, 32], strides = [1, 1]} : vector<2x128xf32> to vector<2x32xf32>
    %159 = vector.extract_strided_slice %155 {offsets = [0, 96], sizes = [2, 32], strides = [1, 1]} : vector<2x128xf32> to vector<2x32xf32>
    %160 = arith.mulf %157, %128 : vector<2x32xf32>
    %161 = arith.mulf %156, %158 : vector<2x32xf32>
    %162 = arith.addf %160, %161 : vector<2x32xf32>
    %163 = math.tanh %162 : vector<2x32xf32>
    %164 = arith.mulf %159, %163 : vector<2x32xf32>
    %165 = vector.extract_strided_slice %24 {offsets = [0, 4, 0], sizes = [2, 1, 128], strides = [1, 1, 1]} : vector<2x8x128xf32> to vector<2x1x128xf32>
    %166 = vector.shape_cast %165 : vector<2x1x128xf32> to vector<2x128xf32>
    %cst_33 = arith.constant dense<0.000000e+00> : vector<2x128xf32>
    %167 = tpu.matmul %147, %2, %cst_33 {dimension_numbers = #tpu.dot_dimension_numbers<[1], [0], [0], [1], [0, 0, 1, 1], [], []>} : vector<2x32xf32>, vector<32x128xf32>, vector<2x128xf32> -> vector<2x128xf32>
    %168 = arith.addf %166, %167 : vector<2x128xf32>
    %169 = arith.mulf %168, %14 : vector<2x128xf32>
    %170 = math.tanh %169 : vector<2x128xf32>
    %171 = arith.mulf %170, %14 : vector<2x128xf32>
    %172 = arith.addf %171, %17 : vector<2x128xf32>
    %173 = vector.extract_strided_slice %172 {offsets = [0, 0], sizes = [2, 32], strides = [1, 1]} : vector<2x128xf32> to vector<2x32xf32>
    %174 = vector.extract_strided_slice %172 {offsets = [0, 32], sizes = [2, 32], strides = [1, 1]} : vector<2x128xf32> to vector<2x32xf32>
    %175 = vector.extract_strided_slice %172 {offsets = [0, 64], sizes = [2, 32], strides = [1, 1]} : vector<2x128xf32> to vector<2x32xf32>
    %176 = vector.extract_strided_slice %172 {offsets = [0, 96], sizes = [2, 32], strides = [1, 1]} : vector<2x128xf32> to vector<2x32xf32>
    %177 = arith.mulf %174, %145 : vector<2x32xf32>
    %178 = arith.mulf %173, %175 : vector<2x32xf32>
    %179 = arith.addf %177, %178 : vector<2x32xf32>
    %180 = math.tanh %179 : vector<2x32xf32>
    %181 = arith.mulf %176, %180 : vector<2x32xf32>
    %cst_34 = arith.constant dense<0.000000e+00> : vector<2x128xf32>
    %182 = tpu.matmul %181, %1, %cst_34 {dimension_numbers = #tpu.dot_dimension_numbers<[1], [0], [0], [1], [0, 0, 1, 1], [], []>} : vector<2x32xf32>, vector<32x128xf32>, vector<2x128xf32> -> vector<2x128xf32>
    %183 = arith.addf %182, %19 : vector<2x128xf32>
    %cst_35 = arith.constant dense<0.000000e+00> : vector<2x128xf32>
    %184 = tpu.matmul %164, %3, %cst_35 {dimension_numbers = #tpu.dot_dimension_numbers<[1], [0], [0], [1], [0, 0, 1, 1], [], []>} : vector<2x32xf32>, vector<32x128xf32>, vector<2x128xf32> -> vector<2x128xf32>
    %185 = arith.addf %183, %184 : vector<2x128xf32>
    %186 = arith.mulf %185, %14 : vector<2x128xf32>
    %187 = math.tanh %186 : vector<2x128xf32>
    %188 = arith.mulf %187, %14 : vector<2x128xf32>
    %189 = arith.addf %188, %17 : vector<2x128xf32>
    %190 = vector.extract_strided_slice %189 {offsets = [0, 0], sizes = [2, 32], strides = [1, 1]} : vector<2x128xf32> to vector<2x32xf32>
    %191 = vector.extract_strided_slice %189 {offsets = [0, 32], sizes = [2, 32], strides = [1, 1]} : vector<2x128xf32> to vector<2x32xf32>
    %192 = vector.extract_strided_slice %189 {offsets = [0, 64], sizes = [2, 32], strides = [1, 1]} : vector<2x128xf32> to vector<2x32xf32>
    %193 = vector.extract_strided_slice %189 {offsets = [0, 96], sizes = [2, 32], strides = [1, 1]} : vector<2x128xf32> to vector<2x32xf32>
    %194 = arith.mulf %191, %162 : vector<2x32xf32>
    %195 = arith.mulf %190, %192 : vector<2x32xf32>
    %196 = arith.addf %194, %195 : vector<2x32xf32>
    %197 = math.tanh %196 : vector<2x32xf32>
    %198 = arith.mulf %193, %197 : vector<2x32xf32>
    %199 = vector.extract_strided_slice %24 {offsets = [0, 5, 0], sizes = [2, 1, 128], strides = [1, 1, 1]} : vector<2x8x128xf32> to vector<2x1x128xf32>
    %200 = vector.shape_cast %199 : vector<2x1x128xf32> to vector<2x128xf32>
    %cst_36 = arith.constant dense<0.000000e+00> : vector<2x128xf32>
    %201 = tpu.matmul %181, %2, %cst_36 {dimension_numbers = #tpu.dot_dimension_numbers<[1], [0], [0], [1], [0, 0, 1, 1], [], []>} : vector<2x32xf32>, vector<32x128xf32>, vector<2x128xf32> -> vector<2x128xf32>
    %202 = arith.addf %200, %201 : vector<2x128xf32>
    %203 = arith.mulf %202, %14 : vector<2x128xf32>
    %204 = math.tanh %203 : vector<2x128xf32>
    %205 = arith.mulf %204, %14 : vector<2x128xf32>
    %206 = arith.addf %205, %17 : vector<2x128xf32>
    %207 = vector.extract_strided_slice %206 {offsets = [0, 0], sizes = [2, 32], strides = [1, 1]} : vector<2x128xf32> to vector<2x32xf32>
    %208 = vector.extract_strided_slice %206 {offsets = [0, 32], sizes = [2, 32], strides = [1, 1]} : vector<2x128xf32> to vector<2x32xf32>
    %209 = vector.extract_strided_slice %206 {offsets = [0, 64], sizes = [2, 32], strides = [1, 1]} : vector<2x128xf32> to vector<2x32xf32>
    %210 = vector.extract_strided_slice %206 {offsets = [0, 96], sizes = [2, 32], strides = [1, 1]} : vector<2x128xf32> to vector<2x32xf32>
    %211 = arith.mulf %208, %179 : vector<2x32xf32>
    %212 = arith.mulf %207, %209 : vector<2x32xf32>
    %213 = arith.addf %211, %212 : vector<2x32xf32>
    %214 = math.tanh %213 : vector<2x32xf32>
    %215 = arith.mulf %210, %214 : vector<2x32xf32>
    %cst_37 = arith.constant dense<0.000000e+00> : vector<2x128xf32>
    %216 = tpu.matmul %215, %1, %cst_37 {dimension_numbers = #tpu.dot_dimension_numbers<[1], [0], [0], [1], [0, 0, 1, 1], [], []>} : vector<2x32xf32>, vector<32x128xf32>, vector<2x128xf32> -> vector<2x128xf32>
    %217 = arith.addf %216, %19 : vector<2x128xf32>
    %cst_38 = arith.constant dense<0.000000e+00> : vector<2x128xf32>
    %218 = tpu.matmul %198, %3, %cst_38 {dimension_numbers = #tpu.dot_dimension_numbers<[1], [0], [0], [1], [0, 0, 1, 1], [], []>} : vector<2x32xf32>, vector<32x128xf32>, vector<2x128xf32> -> vector<2x128xf32>
    %219 = arith.addf %217, %218 : vector<2x128xf32>
    %220 = arith.mulf %219, %14 : vector<2x128xf32>
    %221 = math.tanh %220 : vector<2x128xf32>
    %222 = arith.mulf %221, %14 : vector<2x128xf32>
    %223 = arith.addf %222, %17 : vector<2x128xf32>
    %224 = vector.extract_strided_slice %223 {offsets = [0, 0], sizes = [2, 32], strides = [1, 1]} : vector<2x128xf32> to vector<2x32xf32>
    %225 = vector.extract_strided_slice %223 {offsets = [0, 32], sizes = [2, 32], strides = [1, 1]} : vector<2x128xf32> to vector<2x32xf32>
    %226 = vector.extract_strided_slice %223 {offsets = [0, 64], sizes = [2, 32], strides = [1, 1]} : vector<2x128xf32> to vector<2x32xf32>
    %227 = vector.extract_strided_slice %223 {offsets = [0, 96], sizes = [2, 32], strides = [1, 1]} : vector<2x128xf32> to vector<2x32xf32>
    %228 = arith.mulf %225, %196 : vector<2x32xf32>
    %229 = arith.mulf %224, %226 : vector<2x32xf32>
    %230 = arith.addf %228, %229 : vector<2x32xf32>
    %231 = math.tanh %230 : vector<2x32xf32>
    %232 = arith.mulf %227, %231 : vector<2x32xf32>
    %233 = vector.extract_strided_slice %24 {offsets = [0, 6, 0], sizes = [2, 1, 128], strides = [1, 1, 1]} : vector<2x8x128xf32> to vector<2x1x128xf32>
    %234 = vector.shape_cast %233 : vector<2x1x128xf32> to vector<2x128xf32>
    %cst_39 = arith.constant dense<0.000000e+00> : vector<2x128xf32>
    %235 = tpu.matmul %215, %2, %cst_39 {dimension_numbers = #tpu.dot_dimension_numbers<[1], [0], [0], [1], [0, 0, 1, 1], [], []>} : vector<2x32xf32>, vector<32x128xf32>, vector<2x128xf32> -> vector<2x128xf32>
    %236 = arith.addf %234, %235 : vector<2x128xf32>
    %237 = arith.mulf %236, %14 : vector<2x128xf32>
    %238 = math.tanh %237 : vector<2x128xf32>
    %239 = arith.mulf %238, %14 : vector<2x128xf32>
    %240 = arith.addf %239, %17 : vector<2x128xf32>
    %241 = vector.extract_strided_slice %240 {offsets = [0, 0], sizes = [2, 32], strides = [1, 1]} : vector<2x128xf32> to vector<2x32xf32>
    %242 = vector.extract_strided_slice %240 {offsets = [0, 32], sizes = [2, 32], strides = [1, 1]} : vector<2x128xf32> to vector<2x32xf32>
    %243 = vector.extract_strided_slice %240 {offsets = [0, 64], sizes = [2, 32], strides = [1, 1]} : vector<2x128xf32> to vector<2x32xf32>
    %244 = vector.extract_strided_slice %240 {offsets = [0, 96], sizes = [2, 32], strides = [1, 1]} : vector<2x128xf32> to vector<2x32xf32>
    %245 = arith.mulf %242, %213 : vector<2x32xf32>
    %246 = arith.mulf %241, %243 : vector<2x32xf32>
    %247 = arith.addf %245, %246 : vector<2x32xf32>
    %248 = math.tanh %247 : vector<2x32xf32>
    %249 = arith.mulf %244, %248 : vector<2x32xf32>
    %cst_40 = arith.constant dense<0.000000e+00> : vector<2x128xf32>
    %250 = tpu.matmul %249, %1, %cst_40 {dimension_numbers = #tpu.dot_dimension_numbers<[1], [0], [0], [1], [0, 0, 1, 1], [], []>} : vector<2x32xf32>, vector<32x128xf32>, vector<2x128xf32> -> vector<2x128xf32>
    %251 = arith.addf %250, %19 : vector<2x128xf32>
    %cst_41 = arith.constant dense<0.000000e+00> : vector<2x128xf32>
    %252 = tpu.matmul %232, %3, %cst_41 {dimension_numbers = #tpu.dot_dimension_numbers<[1], [0], [0], [1], [0, 0, 1, 1], [], []>} : vector<2x32xf32>, vector<32x128xf32>, vector<2x128xf32> -> vector<2x128xf32>
    %253 = arith.addf %251, %252 : vector<2x128xf32>
    %254 = arith.mulf %253, %14 : vector<2x128xf32>
    %255 = math.tanh %254 : vector<2x128xf32>
    %256 = arith.mulf %255, %14 : vector<2x128xf32>
    %257 = arith.addf %256, %17 : vector<2x128xf32>
    %258 = vector.extract_strided_slice %257 {offsets = [0, 0], sizes = [2, 32], strides = [1, 1]} : vector<2x128xf32> to vector<2x32xf32>
    %259 = vector.extract_strided_slice %257 {offsets = [0, 32], sizes = [2, 32], strides = [1, 1]} : vector<2x128xf32> to vector<2x32xf32>
    %260 = vector.extract_strided_slice %257 {offsets = [0, 64], sizes = [2, 32], strides = [1, 1]} : vector<2x128xf32> to vector<2x32xf32>
    %261 = vector.extract_strided_slice %257 {offsets = [0, 96], sizes = [2, 32], strides = [1, 1]} : vector<2x128xf32> to vector<2x32xf32>
    %262 = arith.mulf %259, %230 : vector<2x32xf32>
    %263 = arith.mulf %258, %260 : vector<2x32xf32>
    %264 = arith.addf %262, %263 : vector<2x32xf32>
    %265 = math.tanh %264 : vector<2x32xf32>
    %266 = arith.mulf %261, %265 : vector<2x32xf32>
    %267 = vector.extract_strided_slice %24 {offsets = [0, 7, 0], sizes = [2, 1, 128], strides = [1, 1, 1]} : vector<2x8x128xf32> to vector<2x1x128xf32>
    %268 = vector.shape_cast %267 : vector<2x1x128xf32> to vector<2x128xf32>
    %cst_42 = arith.constant dense<0.000000e+00> : vector<2x128xf32>
    %269 = tpu.matmul %249, %2, %cst_42 {dimension_numbers = #tpu.dot_dimension_numbers<[1], [0], [0], [1], [0, 0, 1, 1], [], []>} : vector<2x32xf32>, vector<32x128xf32>, vector<2x128xf32> -> vector<2x128xf32>
    %270 = arith.addf %268, %269 : vector<2x128xf32>
    %271 = arith.mulf %270, %14 : vector<2x128xf32>
    %272 = math.tanh %271 : vector<2x128xf32>
    %273 = arith.mulf %272, %14 : vector<2x128xf32>
    %274 = arith.addf %273, %17 : vector<2x128xf32>
    %275 = vector.extract_strided_slice %274 {offsets = [0, 0], sizes = [2, 32], strides = [1, 1]} : vector<2x128xf32> to vector<2x32xf32>
    %276 = vector.extract_strided_slice %274 {offsets = [0, 32], sizes = [2, 32], strides = [1, 1]} : vector<2x128xf32> to vector<2x32xf32>
    %277 = vector.extract_strided_slice %274 {offsets = [0, 64], sizes = [2, 32], strides = [1, 1]} : vector<2x128xf32> to vector<2x32xf32>
    %278 = vector.extract_strided_slice %274 {offsets = [0, 96], sizes = [2, 32], strides = [1, 1]} : vector<2x128xf32> to vector<2x32xf32>
    %279 = arith.mulf %276, %247 : vector<2x32xf32>
    %280 = arith.mulf %275, %277 : vector<2x32xf32>
    %281 = arith.addf %279, %280 : vector<2x32xf32>
    %282 = math.tanh %281 : vector<2x32xf32>
    %283 = arith.mulf %278, %282 : vector<2x32xf32>
    %cst_43 = arith.constant dense<0.000000e+00> : vector<2x128xf32>
    %284 = tpu.matmul %283, %1, %cst_43 {dimension_numbers = #tpu.dot_dimension_numbers<[1], [0], [0], [1], [0, 0, 1, 1], [], []>} : vector<2x32xf32>, vector<32x128xf32>, vector<2x128xf32> -> vector<2x128xf32>
    %285 = arith.addf %284, %19 : vector<2x128xf32>
    %cst_44 = arith.constant dense<0.000000e+00> : vector<2x128xf32>
    %286 = tpu.matmul %266, %3, %cst_44 {dimension_numbers = #tpu.dot_dimension_numbers<[1], [0], [0], [1], [0, 0, 1, 1], [], []>} : vector<2x32xf32>, vector<32x128xf32>, vector<2x128xf32> -> vector<2x128xf32>
    %287 = arith.addf %285, %286 : vector<2x128xf32>
    %288 = arith.mulf %287, %14 : vector<2x128xf32>
    %289 = math.tanh %288 : vector<2x128xf32>
    %290 = arith.mulf %289, %14 : vector<2x128xf32>
    %291 = arith.addf %290, %17 : vector<2x128xf32>
    %292 = vector.extract_strided_slice %291 {offsets = [0, 0], sizes = [2, 32], strides = [1, 1]} : vector<2x128xf32> to vector<2x32xf32>
    %293 = vector.extract_strided_slice %291 {offsets = [0, 32], sizes = [2, 32], strides = [1, 1]} : vector<2x128xf32> to vector<2x32xf32>
    %294 = vector.extract_strided_slice %291 {offsets = [0, 64], sizes = [2, 32], strides = [1, 1]} : vector<2x128xf32> to vector<2x32xf32>
    %295 = vector.extract_strided_slice %291 {offsets = [0, 96], sizes = [2, 32], strides = [1, 1]} : vector<2x128xf32> to vector<2x32xf32>
    %296 = arith.mulf %293, %264 : vector<2x32xf32>
    %297 = arith.mulf %292, %294 : vector<2x32xf32>
    %298 = arith.addf %296, %297 : vector<2x32xf32>
    %299 = math.tanh %298 : vector<2x32xf32>
    %300 = arith.mulf %295, %299 : vector<2x32xf32>
    %c0_45 = arith.constant 0 : index
    %c0_46 = arith.constant 0 : index
    %301 = vector.load %arg7[%c0_45, %c0_46] : memref<32x8xf32, #tpu.memory_space<vmem>>, vector<32x8xf32>
    %cst_47 = arith.constant dense<0.000000e+00> : vector<2x8xf32>
    %302 = tpu.matmul %300, %301, %cst_47 {dimension_numbers = #tpu.dot_dimension_numbers<[1], [0], [0], [1], [0, 0, 1, 1], [], []>} : vector<2x32xf32>, vector<32x8xf32>, vector<2x8xf32> -> vector<2x8xf32>
    %c0_48 = arith.constant 0 : index
    %c0_49 = arith.constant 0 : index
    %303 = vector.load %arg8[%c0_48, %c0_49] : memref<1x8xf32, #tpu.memory_space<vmem>>, vector<1x8xf32>
    %304 = vector.broadcast %303 : vector<1x8xf32> to vector<2x8xf32>
    %305 = arith.addf %302, %304 : vector<2x8xf32>
    %c0_50 = arith.constant 0 : index
    %c0_51 = arith.constant 0 : index
    %306 = vector.load %arg9[%c0_50, %c0_51] : memref<2x8xf32, #tpu.memory_space<vmem>>, vector<2x8xf32>
    tpu.vector_store %arg9[%c0_50, %c0_51], %305 {strides = array<i32>} : memref<2x8xf32, #tpu.memory_space<vmem>>, vector<2x8xf32>,
    return
  }
}

</mosaic_0001>

<bundles_post_ra>
// kernel: model3_forward.1
= control target key start
LH: loop header
LB: loop body
LE: loop exit
PB: predicated region body
PF: predicated region fallthrough
CT: control target
= control target key end

     0   :  { %14 = vsyncpa [#allocation3], 0  ;;  %s4092_s0 = inlined_call_operand.hbm [shape: f32[16,16], index: 0, kind: input, shape index: {}]   ;;  %s4093_s1 = inlined_call_operand.hbm [shape: f32[16,128], index: 1, kind: input, shape index: {}]   ;;  %s4094_s2 = inlined_call_operand.vmem [shape: f32[32,128], index: 2, kind: input, shape index: {}]   ;;  %s4095_s3 = inlined_call_operand.vmem [shape: f32[1,128], index: 3, kind: input, shape index: {}]   ;;  %s4096_s4 = inlined_call_operand.vmem [shape: f32[32,128], index: 4, kind: input, shape index: {}]   ;;  %s4097_s5 = inlined_call_operand.hbm [shape: f32[32,128], index: 5, kind: input, shape index: {}]   ;;  %s4098_s6 = inlined_call_operand.vmem [shape: f32[1,128], index: 6, kind: input, shape index: {}]   ;;  %s4099_s7 = inlined_call_operand.vmem [shape: f32[32,8], index: 7, kind: input, shape index: {}]   ;;  %s4100_s8 = inlined_call_operand.vmem [shape: f32[1,8], index: 8, kind: input, shape index: {}]   ;;  %s4101_s9 = inlined_call_operand.hbm [shape: f32[2,8], index: 9, kind: output, shape index: {}]  }
   0x1   :  { %15 = vsyncpa [#allocation6], 0 }
   0x2   :  { %16 = vsyncpa [#allocation4], 0  ;;  %s3340_s30 = smov [#allocation5]   ;;  %s3341_s11 = smov [#allocation2]  }
   0x3   :  { %s34_s10 = sshll.u32 %s3340_s30, 4  ;;  %s22_s12 = sshll.u32 %s3341_s11, 4  ;;  %s35_s10 = int_to_ptr.vmem [resolvable:$true] %s34_s10  ;;  %s23_s12 = int_to_ptr.vmem [resolvable:$true] %s22_s12 }
   0x4   :  { %s3262_s13 = scalar_lea.vmem %s35_s10, 256  ;;  %p3267_p1 = scmp.lt.s32.totalorder %s35_s10, %s35_s10 }
   0x5   :  { %p3263_p0 = scmp.ne.s32.totalorder %s35_s10, %s3262_s13  ;;  %p3268_p2 = scmp.lt.s32.totalorder %s3262_s13, %s3262_s13 }
   0x7   :  { %p3269_p3 = por %p3268_p2, %p3267_p1 }
   0x9   :  { %p3270_p4 = pnand %p3269_p3, %p3263_p0 }
   0xb   :  { %3273 = shalt.err (!%p3270_p4)
}
   0xc   :  { %s3342_s14 = smov 128   ;;  %s3343_s15 = smov 8  }
   0xd   :  { %40 = dma.hbm_to_vmem [thread:$0]  %s4093_s1, 256, %s35_s10, [#allocation6], %s3342_s14, %s3342_s14, %s3343_s15  }
   0xe   :  { %s3282_s18 = scalar_lea.vmem %s23_s12, 256  ;;  %p3287_p6 = scmp.lt.s32.totalorder %s23_s12, %s23_s12 }
   0xf   :  { %p3283_p5 = scmp.ne.s32.totalorder %s23_s12, %s3282_s18  ;;  %p3288_p7 = scmp.lt.s32.totalorder %s3282_s18, %s3282_s18 }
  0x11   :  { %p3289_p8 = por %p3288_p7, %p3287_p6 }
  0x13   :  { %p3290_p9 = pnand %p3289_p8, %p3283_p5 }
  0x15   :  { %3293 = shalt.err (!%p3290_p9)
}
  0x16   :  { %28 = dma.hbm_to_vmem [thread:$0]  %s4092_s0, 256, %s23_s12, [#allocation3], %s3342_s14, %s3342_s14, %s3343_s15  }
  0x17   :  { %s3344_s21 = smov [#allocation7]  }
  0x18   :  { %s52_s22 = sshll.u32 %s3344_s21, 4  ;;  %s53_s22 = int_to_ptr.vmem [resolvable:$true] %s52_s22 }
  0x19   :  { %s3302_s23 = scalar_lea.vmem %s53_s22, 512  ;;  %p3307_p11 = scmp.lt.s32.totalorder %s53_s22, %s53_s22 }
  0x1a   :  { %p3303_p10 = scmp.ne.s32.totalorder %s53_s22, %s3302_s23  ;;  %p3308_p12 = scmp.lt.s32.totalorder %s3302_s23, %s3302_s23 }
  0x1c   :  { %p3309_p13 = por %p3308_p12, %p3307_p11 }
  0x1e   :  { %p3310_p0 = pnand %p3309_p13, %p3303_p10 }
  0x20   :  { %3313 = shalt.err (!%p3310_p0)
}
  0x21   :  { %58 = dma.hbm_to_vmem [thread:$0]  %s4097_s5, 512, %s53_s22, [#allocation6], %s3342_s14, %s3342_s14, %s3343_s15  }
  0x22   :  { %3334 = dma.done.wait [#allocation3], 256  }
  0x23   :  { %3335 = vsyncadd [#allocation3], 4294967040 }
  0x24   :  { %3336 = dma.done.wait [#allocation6], 768  }
  0x25   :  { %3337 = vsyncadd [#allocation6], 4294966528  ;;  %v3345_v0 = vmov 0.0   ;;  %vm3346_vm0 = vmmov 0   ;;  %v75_v1 = vld [vmem:[#allocation5 + $0x8] sm:$0xff]  ;;  %v74_v3 = vld [vmem:[#allocation5] sm:$0xff]  ;;  %v90_v9 = vlaneseq }
  0x26   :  { %2859 = vmatprep.subr.mxu1 %v3345_v0  ;;  %2867 = vmatprep.mubr.msk.f32.mxu1 %vm3346_vm0, %v3345_v0  ;;  %v3416_v2 = vld [vmem:[%s4094_s2 + $0x18] sm:$0xff]  ;;  %v3422_v4 = vld [vmem:[%s4094_s2 + $0x10] sm:$0xff]  ;;  %v103_v5 = vld [vmem:[#allocation2] sm:$0xff]  ;;  %vm111_vm1 = vcmask 130048   ;;  %v3347_v17 = vmov 0.5   ;;  %s3349_s12 = smov 32  }
  0x27   :  { %2852 = vmatprep.subr.mxu0 %v75_v1  ;;  %2860 = vmatpush3.msra.mxu1 %v3416_v2  ;;  %v104_v6 = vld [vmem:[#allocation2 + $0x8] sm:$0xff]  ;;  %v3435_v8 = vld [vmem:[%s4094_s2] sm:$0xff]  ;;  %v91_v10 = vand.u32 127, %v90_v9  ;;  %v3487_v43 = vld [vmem:[%s4096_s4 + $0x18] sm:$0xff]  ;;  %vm318_vm5 = vcmask 1041409   ;;  %vm193_vm6 = vcmask 261120  }
  0x28   :  { %2853 = vmatpush3.msra.mxu0 %v75_v1  ;;  %2861 = vmatprep.subr.mxu1 %v3345_v0  ;;  %v3429_v7 = vld [vmem:[%s4094_s2 + $0x8] sm:$0xff]  ;;  %v2696_v12 = vld [vmem:[%s4095_s3] ss:$0 sm:$0xff]  ;;  %s3348_s3 = smov 64   ;;  %v3492_v44 = vld [vmem:[%s4096_s4 + $0x10] sm:$0xff]  ;;  %s3350_s24 = smov [#allocation8]  }
  0x29   :  { %2854 = vmatprep.subr.mxu0 %v74_v3  ;;  %2862 = vmatpush3.msra.mxu1 %v3422_v4  ;;  %vm92_vm2 = vcmp.ge.s32.totalorder %v91_v10, 64  ;;  %vm93_vm3 = vcmp.lt.s32.totalorder %v91_v10, 96  ;;  %v3494_v45 = vld [vmem:[#allocation7 + $0x18] sm:$0xff]  ;;  %v3498_v46 = vld [vmem:[#allocation7 + $0x10] sm:$0xff]  ;;  %v3504_v47 = vld [vmem:[%s4096_s4 + $0x8] sm:$0xff]  ;;  %vm2677_vm7 = vcmask 58368  }
  0x2a   :  { %2855 = vmatpush3.msra.mxu0 %v74_v3  ;;  %2856 = vmatprep.mubr.msk.f32.mxu0 %vm111_vm1, %v103_v5  ;;  %vm3450_vm4 = vmand %vm92_vm2, %vm93_vm3  ;;  %v3507_v48 = vld [vmem:[#allocation7 + $0x8] sm:$0xff]  ;;  %v3515_v49 = vld [vmem:[%s4096_s4] sm:$0xff] }
  0x2b   :  { %2863 = vmatprep.subr.mxu1 %v3345_v0  ;;  %2857 = vmatmul.mubr.msk.f32.vlgmr.msra.gmra.mxu0 %vm111_vm1, %v104_v6  ;;  %v3460_v18 = vsel %vm3450_vm4, 1.0, %v3347_v17  ;;  %v3468_v28 = vsel %vm3450_vm4, 0.0, %v3347_v17  ;;  %v3526_v52 = vld [vmem:[#allocation7] sm:$0xff] }
  0x2c   :  { %2864 = vmatpush3.msra.mxu1 %v3429_v7  ;;  %2870 = vmatprep.subr.mxu0 %v3345_v0 }
  0x2d   :  { %2865 = vmatprep.subr.mxu1 %v3345_v0  ;;  %2878 = vmatprep.mubr.msk.f32.mxu0 %vm3346_vm0, %v3345_v0 }
  0x2e   :  { %2866 = vmatpush3.msra.mxu1 %v3435_v8  ;;  %2871 = vmatpush3.msra.mxu0 %v3487_v43 }
  0x2f   :  { %2868 = vmatmul.mubr.f32.vlgmr.msra.gmra.mxu1 %v3345_v0  ;;  %2881 = vmatprep.subr.mxu1 %v3345_v0 }
  0x30   :  { %2889 = vmatprep.mubr.msk.f32.mxu1 %vm3346_vm0, %v3345_v0  ;;  %2882 = vmatpush3.msra.mxu1 %v3494_v45 }
  0x31   :  { %2872 = vmatprep.subr.mxu0 %v3345_v0  ;;  %2883 = vmatprep.subr.mxu1 %v3345_v0 }
  0x32   :  { %2873 = vmatpush3.msra.mxu0 %v3492_v44  ;;  %2884 = vmatpush3.msra.mxu1 %v3498_v46 }
  0x33   :  { %2874 = vmatprep.subr.mxu0 %v3345_v0  ;;  %2885 = vmatprep.subr.mxu1 %v3345_v0 }
  0x34   :  { %2875 = vmatpush3.msra.mxu0 %v3504_v47  ;;  %2886 = vmatpush3.msra.mxu1 %v3507_v48 }
  0x35   :  { %2876 = vmatprep.subr.mxu0 %v3345_v0  ;;  %2887 = vmatprep.subr.mxu1 %v3345_v0 }
  0x36   :  { %2877 = vmatpush3.msra.mxu0 %v3515_v49  ;;  %2888 = vmatpush3.msra.mxu1 %v3526_v52 }
  0x37   :  { %2892 = vmatprep.subr.mxu0 %v3345_v0  ;;  %2890 = vmatmul.mubr.f32.vlgmr.msra.gmra.mxu1 %v3345_v0 }
  0x38   :  { %2903 = vmatprep.subr.mxu1 %v3345_v0  ;;  %2911 = vmatprep.mubr.msk.f32.mxu1 %vm3346_vm0, %v3345_v0 }
  0x39   :  { %2904 = vmatpush3.msra.mxu1 %v3487_v43 }
  0x3a   :  { %2905 = vmatprep.subr.mxu1 %v3345_v0 }
  0x3b   :  { %2906 = vmatpush3.msra.mxu1 %v3492_v44 }
  0x3c   :  { %2907 = vmatprep.subr.mxu1 %v3345_v0 }
  0x3d   :  { %2908 = vmatpush3.msra.mxu1 %v3504_v47 }
  0x3e   :  { %2909 = vmatprep.subr.mxu1 %v3345_v0 }
  0x3f   :  { %2910 = vmatpush3.msra.mxu1 %v3515_v49 }
  0x40   :  { %2925 = vmatprep.subr.mxu1 %v3345_v0 }
  0xeb   :  { %v2858_v11 = vpop.f32.mrf.mxu0 }
  0xec   :  { %v3454_v15 = vadd.f32 %v2858_v11, %v2696_v12 }
  0xed   :  { %v184_v14 = vpop.f32.mrf.mxu0 }
  0xee   :  { %v3456_v16 = vadd.f32 %v2696_v12, %v184_v14 }
  0xef   :  { %v263_v19 = vpop.f32.mrf.mxu1 }
  0xf0   :  { %v268_v20 = vrot.slane %v263_v19, 1  ;;  %v271_v21 = vadd.f32 %v263_v19, %v3456_v16 }
  0xf1   :  { %v2869_v22 = vpop.f32.mrf.mxu1 }
  0xf2   :  { %v272_v23 = vadd.f32 %v268_v20, %v3454_v15  ;;  %v273_v24 = vmul.f32 %v271_v21, %v3460_v18  ;;  %v3578_v21 = vld [vmem:[%s4098_s6] ss:$0 sm:$0xff] }
  0xf4   :  { %v274_v25 = vmul.f32 %v272_v23, %v3460_v18  ;;  %3145 = vtanh.f32 %v273_v24 }
  0xf6   :  { %3147 = vtanh.f32 %v274_v25 }
  0xf7   :  { %v460_v60 = vpop.f32.mrf.mxu1 }
  0xf9   :  { %v2891_v61 = vpop.f32.mrf.mxu1 }
 0x101   :  { %v3146_v26 = vpop.eup %3145 }
 0x102   :  { %v277_v31 = vmul.f32 %v3146_v26, %v3460_v18 }
 0x103   :  { %v3148_v27 = vpop.eup %3147 }
 0x104   :  { %v278_v29 = vmul.f32 %v3148_v27, %v3460_v18  ;;  %v279_v32 = vadd.f32 %v277_v31, %v3468_v28 }
 0x106   :  { %v280_v30 = vadd.f32 %v278_v29, %v3468_v28  ;;  %v281_v40 = vmul.f32 0.0, %v279_v32 }
 0x108   :  { %287 = vrot.lane.b32.xlu0 %v280_v30, %s3348_s3  ;;  %v282_v37 = vmul.f32 0.0, %v280_v30 }
 0x10c   :  { %285 = vrot.lane.b32.xlu0 %v279_v32, %s3348_s3 }
 0x17a   :  { %v288_v33 = vpop.permute.xlu0 %287 }
 0x17b   :  { %v292_v34 = vmul.f32 %v288_v33, %v280_v30 }
 0x17d   :  { %297 = vrot.lane.b32.xlu1 %v292_v34, %s3349_s12 }
 0x17e   :  { %v286_v35 = vpop.permute.xlu0 %285 }
 0x17f   :  { %v291_v36 = vmul.f32 %v286_v35, %v279_v32 }
 0x181   :  { %295 = vrot.lane.b32.xlu1 %v291_v36, %s3349_s12 }
 0x1ef   :  { %v298_v38 = vpop.permute.xlu1 %297 }
 0x1f0   :  { %v3478_v39 = vadd.f32 %v298_v38, %v282_v37 }
 0x1f2   :  { %3149 = vtanh.f32 %v3478_v39  ;;  %v573_v33 = vrot.slane %v3478_v39, 7 }
 0x1f3   :  { %v296_v41 = vpop.permute.xlu1 %295 }
 0x1f4   :  { %v3481_v42 = vadd.f32 %v296_v41, %v281_v40 }
 0x1f6   :  { %3151 = vtanh.f32 %v3481_v42  ;;  %v572_v34 = vrot.slane %v3481_v42, 7 }
 0x1ff   :  { %v3150_v50 = vpop.eup %3149 }
 0x200   :  { %309 = vrot.lane.b32.xlu0 %v3150_v50, %s3348_s3 }
 0x203   :  { %v3152_v51 = vpop.eup %3151 }
 0x204   :  { %307 = vrot.lane.b32.xlu1 %v3152_v51, %s3348_s3 }
 0x272   :  { %v310_v53 = vpop.permute.xlu0 %309 }
 0x273   :  { %v314_v54 = vmul.f32 %v310_v53, %v280_v30 }
 0x275   :  { %v317_v56 = vrot.slane %v314_v54, 7 }
 0x276   :  { %v308_v55 = vpop.permute.xlu1 %307 }
 0x277   :  { %v313_v57 = vmul.f32 %v308_v55, %v279_v32 }
 0x279   :  { %v319_v58 = vsel %vm318_vm5, %v317_v56, %v313_v57 }
 0x27a   :  { %320 = vrot.lane.b32.xlu0 %v319_v58, %s3349_s12 }
 0x2ec   :  { %v321_v59 = vpop.permute.xlu0 %320 }
 0x2ed   :  { %2879 = vmatmul.mubr.msk.f32.vlgmr.msra.gmra.mxu0 %vm193_vm6, %v321_v59 }
 0x2ee   :  { %2893 = vmatpush3.msra.mxu0 %v3416_v2  ;;  %2900 = vmatprep.mubr.msk.f32.mxu0 %vm3346_vm0, %v3345_v0 }
 0x2ef   :  { %2894 = vmatprep.subr.mxu0 %v3345_v0 }
 0x2f0   :  { %2895 = vmatpush3.msra.mxu0 %v3422_v4 }
 0x2f1   :  { %2896 = vmatprep.subr.mxu0 %v3345_v0 }
 0x2f2   :  { %2897 = vmatpush3.msra.mxu0 %v3429_v7 }
 0x2f3   :  { %2898 = vmatprep.subr.mxu0 %v3345_v0 }
 0x2f4   :  { %2899 = vmatpush3.msra.mxu0 %v3435_v8 }
 0x2f5   :  { %2901 = vmatmul.mubr.msk.f32.vlgmr.msra.gmra.mxu0 %vm193_vm6, %v321_v59  ;;  %2914 = vmatprep.subr.mxu0 %v3345_v0 }
 0x2f6   :  { %2915 = vmatpush3.msra.mxu0 %v3494_v45  ;;  %2922 = vmatprep.mubr.msk.f32.mxu0 %vm3346_vm0, %v3345_v0 }
 0x2f7   :  { %2916 = vmatprep.subr.mxu0 %v3345_v0 }
 0x2f8   :  { %2917 = vmatpush3.msra.mxu0 %v3498_v46 }
 0x2f9   :  { %2918 = vmatprep.subr.mxu0 %v3345_v0 }
 0x2fa   :  { %2919 = vmatpush3.msra.mxu0 %v3507_v48 }
 0x2fb   :  { %2920 = vmatprep.subr.mxu0 %v3345_v0 }
 0x2fc   :  { %2921 = vmatpush3.msra.mxu0 %v3526_v52 }
 0x2fd   :  { %2936 = vmatprep.subr.mxu0 %v3345_v0 }
 0x3ad   :  { %v390_v62 = vpop.f32.mrf.mxu0 }
 0x3ae   :  { %v391_v22 = vadd.f32 %v3578_v21, %v390_v62 }
 0x3af   :  { %v2880_v63 = vpop.f32.mrf.mxu0 }
 0x3b0   :  { %v464_v23 = vadd.f32 %v460_v60, %v391_v22 }
 0x3b2   :  { %v465_v24 = vmul.f32 %v464_v23, %v3460_v18 }
 0x3b5   :  { %v552_v1 = vpop.f32.mrf.mxu0 }
 0x3b6   :  { %v557_v3 = vrot.slane %v552_v1, 7  ;;  %v561_v5 = vadd.f32 %v552_v1, %v3454_v15 }
 0x3b7   :  { %v2902_v6 = vpop.f32.mrf.mxu0 }
 0x3b8   :  { %v560_v9 = vadd.f32 %v557_v3, %v3456_v16  ;;  %v563_v10 = vmul.f32 %v561_v5, %v3460_v18 }
 0x3ba   :  { %v562_v11 = vmul.f32 %v560_v9, %v3460_v18  ;;  %3153 = vtanh.f32 %v563_v10 }
 0x3bc   :  { %3155 = vtanh.f32 %v562_v11 }
 0x3bd   :  { %3157 = vtanh.f32 %v465_v24 }
 0x3c7   :  { %v3154_v12 = vpop.eup %3153 }
 0x3c8   :  { %v567_v13 = vmul.f32 %v3154_v12, %v3460_v18 }
 0x3c9   :  { %v3156_v14 = vpop.eup %3155 }
 0x3ca   :  { %v569_v17 = vadd.f32 %v567_v13, %v3468_v28  ;;  %v566_v19 = vmul.f32 %v3156_v14, %v3460_v18  ;;  %v3158_v25 = vpop.eup %3157 }
 0x3cb   :  { %v467_v31 = vmul.f32 %v3158_v25, %v3460_v18 }
 0x3cc   :  { %582 = vrot.lane.b32.xlu0 %v569_v17, %s3348_s3  ;;  %v568_v20 = vadd.f32 %v566_v19, %v3468_v28  ;;  %v577_v35 = vmul.f32 %v573_v33, %v569_v17 }
 0x3cd   :  { %v468_v32 = vadd.f32 %v467_v31, %v3468_v28 }
 0x3ce   :  { %580 = vrot.lane.b32.xlu1 %v568_v20, %s3348_s3  ;;  %v576_v38 = vmul.f32 %v572_v34, %v568_v20 }
 0x3cf   :  { %v469_v58 = vmul.f32 0.0, %v468_v32 }
 0x43e   :  { %v583_v26 = vpop.permute.xlu0 %582 }
 0x43f   :  { %v587_v27 = vmul.f32 %v583_v26, %v569_v17 }
 0x440   :  { %v581_v29 = vpop.permute.xlu1 %580 }
 0x441   :  { %v586_v30 = vmul.f32 %v581_v29, %v568_v20  ;;  %592 = vrot.lane.b32.xlu0 %v587_v27, %s3349_s12 }
 0x443   :  { %590 = vrot.lane.b32.xlu1 %v586_v30, %s3349_s12 }
 0x447   :  { %471 = vrot.lane.b32.xlu1 %v468_v32, %s3348_s3 }
 0x4b3   :  { %v593_v36 = vpop.permute.xlu0 %592 }
 0x4b4   :  { %v3589_v37 = vadd.f32 %v593_v36, %v577_v35 }
 0x4b5   :  { %v591_v40 = vpop.permute.xlu1 %590 }
 0x4b6   :  { %3159 = vtanh.f32 %v3589_v37  ;;  %v3592_v41 = vadd.f32 %v591_v40, %v576_v38 }
 0x4b8   :  { %3161 = vtanh.f32 %v3592_v41 }
 0x4b9   :  { %v472_v53 = vpop.permute.xlu1 %471 }
 0x4ba   :  { %v474_v39 = vmul.f32 %v472_v53, %v468_v32  ;;  %v872_v53 = vrot.slane %v3592_v41, 7 }
 0x4c3   :  { %v3160_v50 = vpop.eup %3159 }
 0x4c4   :  { %604 = vrot.lane.b32.xlu1 %v3160_v50, %s3348_s3 }
 0x4c5   :  { %v3162_v51 = vpop.eup %3161 }
 0x4c6   :  { %602 = vrot.lane.b32.xlu0 %v3162_v51, %s3348_s3 }
 0x4ca   :  { %476 = vrot.lane.b32.xlu0 %v474_v39, %s3349_s12  ;;  %v873_v39 = vrot.slane %v3589_v37, 7 }
 0x536   :  { %v605_v42 = vpop.permute.xlu1 %604 }
 0x537   :  { %v609_v56 = vmul.f32 %v605_v42, %v569_v17 }
 0x538   :  { %v603_v54 = vpop.permute.xlu0 %602 }
 0x539   :  { %v608_v55 = vmul.f32 %v603_v54, %v568_v20 }
 0x53b   :  { %v612_v57 = vrot.slane %v608_v55, 1 }
 0x53c   :  { %v477_v59 = vpop.permute.xlu0 %476 }
 0x53d   :  { %v3598_v60 = vadd.f32 %v477_v59, %v469_v58  ;;  %v613_v61 = vsel %vm318_vm5, %v609_v56, %v612_v57 }
 0x53e   :  { %614 = vrot.lane.b32.xlu1 %v613_v61, %s3349_s12 }
 0x53f   :  { %3163 = vtanh.f32 %v3598_v60 }
 0x54c   :  { %v3164_v62 = vpop.eup %3163 }
 0x54d   :  { %482 = vrot.lane.b32.xlu0 %v3164_v62, %s3348_s3 }
 0x5b0   :  { %v615_v63 = vpop.permute.xlu1 %614 }
 0x5b1   :  { %2912 = vmatmul.mubr.msk.f32.vlgmr.msra.gmra.mxu1 %vm193_vm6, %v615_v63 }
 0x5b2   :  { %2926 = vmatpush3.msra.mxu1 %v3416_v2  ;;  %2933 = vmatprep.mubr.msk.f32.mxu1 %vm3346_vm0, %v3345_v0 }
 0x5b3   :  { %2927 = vmatprep.subr.mxu1 %v3345_v0 }
 0x5b4   :  { %2928 = vmatpush3.msra.mxu1 %v3422_v4 }
 0x5b5   :  { %2929 = vmatprep.subr.mxu1 %v3345_v0 }
 0x5b6   :  { %2930 = vmatpush3.msra.mxu1 %v3429_v7 }
 0x5b7   :  { %2931 = vmatprep.subr.mxu1 %v3345_v0 }
 0x5b8   :  { %2932 = vmatpush3.msra.mxu1 %v3435_v8 }
 0x5b9   :  { %2934 = vmatmul.mubr.msk.f32.vlgmr.msra.gmra.mxu1 %vm193_vm6, %v615_v63  ;;  %2947 = vmatprep.subr.mxu1 %v3345_v0 }
 0x5ba   :  { %2948 = vmatpush3.msra.mxu1 %v3494_v45  ;;  %2955 = vmatprep.mubr.msk.f32.mxu1 %vm3346_vm0, %v3345_v0 }
 0x5bb   :  { %2949 = vmatprep.subr.mxu1 %v3345_v0 }
 0x5bc   :  { %2950 = vmatpush3.msra.mxu1 %v3498_v46 }
 0x5bd   :  { %2951 = vmatprep.subr.mxu1 %v3345_v0 }
 0x5be   :  { %2952 = vmatpush3.msra.mxu1 %v3507_v48 }
 0x5bf   :  { %v483_v1 = vpop.permute.xlu0 %482  ;;  %2953 = vmatprep.subr.mxu1 %v3345_v0 }
 0x5c0   :  { %v485_v3 = vmul.f32 %v483_v1, %v468_v32  ;;  %2954 = vmatpush3.msra.mxu1 %v3526_v52 }
 0x5c1   :  { %2969 = vmatprep.subr.mxu1 %v3345_v0 }
 0x5c2   :  { %689 = vrot.lane.b32.xlu1 %v485_v3, %s3349_s12 }
 0x634   :  { %v690_v5 = vpop.permute.xlu1 %689 }
 0x635   :  { %2923 = vmatmul.mubr.msk.f32.vlgmr.msra.gmra.mxu0 %vm193_vm6, %v690_v5 }
 0x636   :  { %2937 = vmatpush3.msra.mxu0 %v3487_v43  ;;  %2944 = vmatprep.mubr.msk.f32.mxu0 %vm3346_vm0, %v3345_v0 }
 0x637   :  { %2938 = vmatprep.subr.mxu0 %v3345_v0 }
 0x638   :  { %2939 = vmatpush3.msra.mxu0 %v3492_v44 }
 0x639   :  { %2940 = vmatprep.subr.mxu0 %v3345_v0 }
 0x63a   :  { %2941 = vmatpush3.msra.mxu0 %v3504_v47 }
 0x63b   :  { %2942 = vmatprep.subr.mxu0 %v3345_v0 }
 0x63c   :  { %2943 = vmatpush3.msra.mxu0 %v3515_v49 }
 0x63d   :  { %2958 = vmatprep.subr.mxu0 %v3345_v0 }
 0x671   :  { %v684_v6 = vpop.f32.mrf.mxu1 }
 0x672   :  { %v685_v29 = vadd.f32 %v3578_v21, %v684_v6 }
 0x673   :  { %v2913_v9 = vpop.f32.mrf.mxu1 }
 0x679   :  { %v851_v10 = vpop.f32.mrf.mxu1 }
 0x67a   :  { %v856_v11 = vrot.slane %v851_v10, 6  ;;  %v857_v12 = vrot.slane %v851_v10, 7 }
 0x67b   :  { %v2935_v13 = vpop.f32.mrf.mxu1 }
 0x67c   :  { %v860_v14 = vadd.f32 %v856_v11, %v3456_v16  ;;  %v861_v17 = vadd.f32 %v857_v12, %v3454_v15 }
 0x67e   :  { %v862_v19 = vmul.f32 %v860_v14, %v3460_v18  ;;  %v863_v20 = vmul.f32 %v861_v17, %v3460_v18 }
 0x680   :  { %3165 = vtanh.f32 %v862_v19 }
 0x681   :  { %3167 = vtanh.f32 %v863_v20 }
 0x68d   :  { %v3166_v22 = vpop.eup %3165 }
 0x68e   :  { %v3168_v23 = vpop.eup %3167  ;;  %v866_v24 = vmul.f32 %v3166_v22, %v3460_v18 }
 0x68f   :  { %v867_v25 = vmul.f32 %v3168_v23, %v3460_v18 }
 0x690   :  { %v868_v26 = vadd.f32 %v866_v24, %v3468_v28 }
 0x691   :  { %v869_v27 = vadd.f32 %v867_v25, %v3468_v28 }
 0x692   :  { %880 = vrot.lane.b32.xlu0 %v868_v26, %s3348_s3  ;;  %v876_v42 = vmul.f32 %v872_v53, %v868_v26 }
 0x693   :  { %882 = vrot.lane.b32.xlu1 %v869_v27, %s3348_s3  ;;  %v877_v54 = vmul.f32 %v873_v39, %v869_v27 }
 0x6f5   :  { %v759_v30 = vpop.f32.mrf.mxu0 }
 0x6f6   :  { %v763_v31 = vadd.f32 %v759_v30, %v685_v29 }
 0x6f7   :  { %v2924_v32 = vpop.f32.mrf.mxu0 }
 0x6f8   :  { %v764_v33 = vmul.f32 %v763_v31, %v3460_v18 }
 0x6fa   :  { %3169 = vtanh.f32 %v764_v33 }
 0x704   :  { %v881_v34 = vpop.permute.xlu0 %880 }
 0x705   :  { %v883_v35 = vpop.permute.xlu1 %882  ;;  %v886_v36 = vmul.f32 %v881_v34, %v868_v26 }
 0x706   :  { %v887_v38 = vmul.f32 %v883_v35, %v869_v27 }
 0x707   :  { %v3170_v40 = vpop.eup %3169  ;;  %890 = vrot.lane.b32.xlu0 %v886_v36, %s3349_s12 }
 0x708   :  { %892 = vrot.lane.b32.xlu1 %v887_v38, %s3349_s12  ;;  %v766_v50 = vmul.f32 %v3170_v40, %v3460_v18 }
 0x70a   :  { %v767_v51 = vadd.f32 %v766_v50, %v3468_v28 }
 0x70c   :  { %770 = vrot.lane.b32.xlu0 %v767_v51, %s3348_s3  ;;  %v768_v37 = vmul.f32 %v767_v51, %v3598_v60 }
 0x779   :  { %v891_v55 = vpop.permute.xlu0 %890 }
 0x77a   :  { %v893_v56 = vpop.permute.xlu1 %892  ;;  %v3657_v57 = vadd.f32 %v891_v55, %v876_v42 }
 0x77b   :  { %v3659_v58 = vadd.f32 %v893_v56, %v877_v54 }
 0x77c   :  { %3171 = vtanh.f32 %v3657_v57 }
 0x77d   :  { %3173 = vtanh.f32 %v3659_v58 }
 0x77e   :  { %v771_v59 = vpop.permute.xlu0 %770 }
 0x77f   :  { %v773_v61 = vmul.f32 %v771_v59, %v767_v51 }
 0x781   :  { %775 = vrot.lane.b32.xlu1 %v773_v61, %s3349_s12 }
 0x789   :  { %v3172_v62 = vpop.eup %3171 }
 0x78a   :  { %v3174_v41 = vpop.eup %3173  ;;  %902 = vrot.lane.b32.xlu0 %v3172_v62, %s3348_s3 }
 0x78b   :  { %904 = vrot.lane.b32.xlu1 %v3174_v41, %s3348_s3 }
 0x7f3   :  { %v776_v63 = vpop.permute.xlu1 %775 }
 0x7f4   :  { %v3667_v1 = vadd.f32 %v776_v63, %v768_v37  ;;  %v1173_v63 = vrot.slane %v3657_v57, 7 }
 0x7f6   :  { %3175 = vtanh.f32 %v3667_v1 }
 0x7fc   :  { %v903_v3 = vpop.permute.xlu0 %902 }
 0x7fd   :  { %v905_v5 = vpop.permute.xlu1 %904  ;;  %v908_v6 = vmul.f32 %v903_v3, %v868_v26  ;;  %v1174_v3 = vrot.slane %v3659_v58, 7 }
 0x7fe   :  { %v909_v9 = vmul.f32 %v905_v5, %v869_v27 }
 0x7ff   :  { %v912_v10 = vrot.slane %v908_v6, 2 }
 0x800   :  { %v913_v11 = vrot.slane %v909_v9, 1 }
 0x802   :  { %v914_v12 = vsel %vm318_vm5, %v913_v11, %v912_v10 }
 0x803   :  { %v3176_v13 = vpop.eup %3175  ;;  %915 = vrot.lane.b32.xlu0 %v914_v12, %s3349_s12 }
 0x804   :  { %781 = vrot.lane.b32.xlu1 %v3176_v13, %s3348_s3 }
 0x875   :  { %v916_v14 = vpop.permute.xlu0 %915 }
 0x876   :  { %2945 = vmatmul.mubr.msk.f32.vlgmr.msra.gmra.mxu0 %vm193_vm6, %v916_v14  ;;  %v782_v60 = vpop.permute.xlu1 %781 }
 0x877   :  { %2959 = vmatpush3.msra.mxu0 %v3416_v2  ;;  %v784_v17 = vmul.f32 %v782_v60, %v767_v51  ;;  %2966 = vmatprep.mubr.msk.f32.mxu0 %vm3346_vm0, %v3345_v0 }
 0x878   :  { %2960 = vmatprep.subr.mxu0 %v3345_v0 }
 0x879   :  { %2961 = vmatpush3.msra.mxu0 %v3422_v4  ;;  %990 = vrot.lane.b32.xlu0 %v784_v17, %s3349_s12 }
 0x87a   :  { %2962 = vmatprep.subr.mxu0 %v3345_v0 }
 0x87b   :  { %2963 = vmatpush3.msra.mxu0 %v3429_v7 }
 0x87c   :  { %2964 = vmatprep.subr.mxu0 %v3345_v0 }
 0x87d   :  { %2965 = vmatpush3.msra.mxu0 %v3435_v8 }
 0x87e   :  { %2967 = vmatmul.mubr.msk.f32.vlgmr.msra.gmra.mxu0 %vm193_vm6, %v916_v14  ;;  %2980 = vmatprep.subr.mxu0 %v3345_v0 }
 0x87f   :  { %2981 = vmatpush3.msra.mxu0 %v3494_v45  ;;  %2988 = vmatprep.mubr.msk.f32.mxu0 %vm3346_vm0, %v3345_v0 }
 0x880   :  { %2982 = vmatprep.subr.mxu0 %v3345_v0 }
 0x881   :  { %2983 = vmatpush3.msra.mxu0 %v3498_v46 }
 0x882   :  { %2984 = vmatprep.subr.mxu0 %v3345_v0 }
 0x883   :  { %2985 = vmatpush3.msra.mxu0 %v3507_v48 }
 0x884   :  { %2986 = vmatprep.subr.mxu0 %v3345_v0 }
 0x885   :  { %2987 = vmatpush3.msra.mxu0 %v3526_v52 }
 0x886   :  { %3002 = vmatprep.subr.mxu0 %v3345_v0 }
 0x8eb   :  { %v991_v19 = vpop.permute.xlu0 %990 }
 0x8ec   :  { %2956 = vmatmul.mubr.msk.f32.vlgmr.msra.gmra.mxu1 %vm193_vm6, %v991_v19 }
 0x8ed   :  { %2970 = vmatpush3.msra.mxu1 %v3487_v43  ;;  %2977 = vmatprep.mubr.msk.f32.mxu1 %vm3346_vm0, %v3345_v0 }
 0x8ee   :  { %2971 = vmatprep.subr.mxu1 %v3345_v0 }
 0x8ef   :  { %2972 = vmatpush3.msra.mxu1 %v3492_v44 }
 0x8f0   :  { %2973 = vmatprep.subr.mxu1 %v3345_v0 }
 0x8f1   :  { %2974 = vmatpush3.msra.mxu1 %v3504_v47 }
 0x8f2   :  { %2975 = vmatprep.subr.mxu1 %v3345_v0 }
 0x8f3   :  { %2976 = vmatpush3.msra.mxu1 %v3515_v49 }
 0x8f4   :  { %2991 = vmatprep.subr.mxu1 %v3345_v0 }
 0x936   :  { %v985_v20 = vpop.f32.mrf.mxu0 }
 0x937   :  { %v986_v40 = vadd.f32 %v3578_v21, %v985_v20 }
 0x938   :  { %v2946_v22 = vpop.f32.mrf.mxu0 }
 0x93e   :  { %v1152_v23 = vpop.f32.mrf.mxu0 }
 0x93f   :  { %v1157_v24 = vrot.slane %v1152_v23, 5  ;;  %v1158_v25 = vrot.slane %v1152_v23, 6 }
 0x940   :  { %v2968_v26 = vpop.f32.mrf.mxu0 }
 0x941   :  { %v1161_v27 = vadd.f32 %v1157_v24, %v3456_v16  ;;  %v1162_v29 = vadd.f32 %v1158_v25, %v3454_v15 }
 0x943   :  { %v1163_v30 = vmul.f32 %v1161_v27, %v3460_v18  ;;  %v1164_v31 = vmul.f32 %v1162_v29, %v3460_v18 }
 0x945   :  { %3177 = vtanh.f32 %v1163_v30 }
 0x946   :  { %3179 = vtanh.f32 %v1164_v31 }
 0x952   :  { %v3178_v32 = vpop.eup %3177 }
 0x953   :  { %v3180_v33 = vpop.eup %3179  ;;  %v1167_v34 = vmul.f32 %v3178_v32, %v3460_v18 }
 0x954   :  { %v1168_v35 = vmul.f32 %v3180_v33, %v3460_v18 }
 0x955   :  { %v1169_v36 = vadd.f32 %v1167_v34, %v3468_v28 }
 0x956   :  { %v1170_v38 = vadd.f32 %v1168_v35, %v3468_v28 }
 0x957   :  { %1181 = vrot.lane.b32.xlu1 %v1169_v36, %s3348_s3  ;;  %v1177_v5 = vmul.f32 %v1173_v63, %v1169_v36 }
 0x958   :  { %1183 = vrot.lane.b32.xlu0 %v1170_v38, %s3348_s3  ;;  %v1178_v9 = vmul.f32 %v1174_v3, %v1170_v38 }
 0x9ac   :  { %v1060_v50 = vpop.f32.mrf.mxu1 }
 0x9ad   :  { %v1064_v51 = vadd.f32 %v1060_v50, %v986_v40 }
 0x9ae   :  { %v2957_v53 = vpop.f32.mrf.mxu1 }
 0x9af   :  { %v1065_v39 = vmul.f32 %v1064_v51, %v3460_v18 }
 0x9b1   :  { %3181 = vtanh.f32 %v1065_v39 }
 0x9be   :  { %v3182_v42 = vpop.eup %3181 }
 0x9bf   :  { %v1067_v54 = vmul.f32 %v3182_v42, %v3460_v18 }
 0x9c1   :  { %v1068_v55 = vadd.f32 %v1067_v54, %v3468_v28 }
 0x9c3   :  { %1071 = vrot.lane.b32.xlu1 %v1068_v55, %s3348_s3  ;;  %v1069_v57 = vmul.f32 %v1068_v55, %v3667_v1 }
 0x9c9   :  { %v1182_v56 = vpop.permute.xlu1 %1181 }
 0x9ca   :  { %v1184_v59 = vpop.permute.xlu0 %1183  ;;  %v1187_v61 = vmul.f32 %v1182_v56, %v1169_v36 }
 0x9cb   :  { %v1188_v62 = vmul.f32 %v1184_v59, %v1170_v38 }
 0x9cc   :  { %1191 = vrot.lane.b32.xlu0 %v1187_v61, %s3349_s12 }
 0x9cd   :  { %1193 = vrot.lane.b32.xlu1 %v1188_v62, %s3349_s12 }
 0xa35   :  { %v1072_v41 = vpop.permute.xlu1 %1071 }
 0xa36   :  { %v1074_v37 = vmul.f32 %v1072_v41, %v1068_v55 }
 0xa38   :  { %1076 = vrot.lane.b32.xlu0 %v1074_v37, %s3349_s12 }
 0xa3e   :  { %v1192_v6 = vpop.permute.xlu0 %1191 }
 0xa3f   :  { %v3727_v10 = vadd.f32 %v1192_v6, %v1177_v5  ;;  %v1194_v11 = vpop.permute.xlu1 %1193 }
 0xa40   :  { %v3729_v12 = vadd.f32 %v1194_v11, %v1178_v9 }
 0xa41   :  { %3183 = vtanh.f32 %v3727_v10 }
 0xa42   :  { %3185 = vtanh.f32 %v3729_v12 }
 0xa4e   :  { %v3184_v13 = vpop.eup %3183 }
 0xa4f   :  { %v3186_v14 = vpop.eup %3185  ;;  %1203 = vrot.lane.b32.xlu1 %v3184_v13, %s3348_s3 }
 0xa50   :  { %1205 = vrot.lane.b32.xlu0 %v3186_v14, %s3348_s3  ;;  %v1474_v14 = vrot.slane %v3727_v10, 7 }
 0xaaa   :  { %v1077_v58 = vpop.permute.xlu0 %1076 }
 0xaab   :  { %v3736_v60 = vadd.f32 %v1077_v58, %v1069_v57  ;;  %v1475_v57 = vrot.slane %v3729_v12, 7 }
 0xaad   :  { %3187 = vtanh.f32 %v3736_v60 }
 0xaba   :  { %v3188_v17 = vpop.eup %3187 }
 0xabb   :  { %1082 = vrot.lane.b32.xlu1 %v3188_v17, %s3348_s3 }
 0xac1   :  { %v1204_v19 = vpop.permute.xlu1 %1203 }
 0xac2   :  { %v1206_v20 = vpop.permute.xlu0 %1205  ;;  %v1209_v22 = vmul.f32 %v1204_v19, %v1169_v36 }
 0xac3   :  { %v1210_v23 = vmul.f32 %v1206_v20, %v1170_v38 }
 0xac4   :  { %v1213_v24 = vrot.slane %v1209_v22, 3 }
 0xac5   :  { %v1214_v25 = vrot.slane %v1210_v23, 2 }
 0xac7   :  { %v1215_v26 = vsel %vm318_vm5, %v1214_v25, %v1213_v24 }
 0xac8   :  { %1216 = vrot.lane.b32.xlu0 %v1215_v26, %s3349_s12 }
 0xb2d   :  { %v1083_v27 = vpop.permute.xlu1 %1082 }
 0xb2e   :  { %v1085_v1 = vmul.f32 %v1083_v27, %v1068_v55 }
 0xb30   :  { %1291 = vrot.lane.b32.xlu1 %v1085_v1, %s3349_s12 }
 0xb3a   :  { %v1217_v29 = vpop.permute.xlu0 %1216 }
 0xb3b   :  { %2978 = vmatmul.mubr.msk.f32.vlgmr.msra.gmra.mxu1 %vm193_vm6, %v1217_v29 }
 0xb3c   :  { %2992 = vmatpush3.msra.mxu1 %v3416_v2  ;;  %2999 = vmatprep.mubr.msk.f32.mxu1 %vm3346_vm0, %v3345_v0 }
 0xb3d   :  { %2993 = vmatprep.subr.mxu1 %v3345_v0 }
 0xb3e   :  { %2994 = vmatpush3.msra.mxu1 %v3422_v4 }
 0xb3f   :  { %2995 = vmatprep.subr.mxu1 %v3345_v0 }
 0xb40   :  { %2996 = vmatpush3.msra.mxu1 %v3429_v7 }
 0xb41   :  { %2997 = vmatprep.subr.mxu1 %v3345_v0 }
 0xb42   :  { %2998 = vmatpush3.msra.mxu1 %v3435_v8 }
 0xb43   :  { %3000 = vmatmul.mubr.msk.f32.vlgmr.msra.gmra.mxu1 %vm193_vm6, %v1217_v29  ;;  %3013 = vmatprep.subr.mxu1 %v3345_v0 }
 0xb44   :  { %3014 = vmatpush3.msra.mxu1 %v3494_v45  ;;  %3021 = vmatprep.mubr.msk.f32.mxu1 %vm3346_vm0, %v3345_v0 }
 0xb45   :  { %3015 = vmatprep.subr.mxu1 %v3345_v0 }
 0xb46   :  { %3016 = vmatpush3.msra.mxu1 %v3498_v46 }
 0xb47   :  { %3017 = vmatprep.subr.mxu1 %v3345_v0 }
 0xb48   :  { %3018 = vmatpush3.msra.mxu1 %v3507_v48 }
 0xb49   :  { %3019 = vmatprep.subr.mxu1 %v3345_v0 }
 0xb4a   :  { %3020 = vmatpush3.msra.mxu1 %v3526_v52 }
 0xb4b   :  { %3035 = vmatprep.subr.mxu1 %v3345_v0 }
 0xba2   :  { %v1292_v2 = vpop.permute.xlu1 %1291 }
 0xba3   :  { %2989 = vmatmul.mubr.msk.f32.vlgmr.msra.gmra.mxu0 %vm193_vm6, %v1292_v2 }
 0xba4   :  { %3003 = vmatpush3.msra.mxu0 %v3487_v43  ;;  %3010 = vmatprep.mubr.msk.f32.mxu0 %vm3346_vm0, %v3345_v0 }
 0xba5   :  { %3004 = vmatprep.subr.mxu0 %v3345_v0 }
 0xba6   :  { %3005 = vmatpush3.msra.mxu0 %v3492_v44 }
 0xba7   :  { %3006 = vmatprep.subr.mxu0 %v3345_v0 }
 0xba8   :  { %3007 = vmatpush3.msra.mxu0 %v3504_v47 }
 0xba9   :  { %3008 = vmatprep.subr.mxu0 %v3345_v0 }
 0xbaa   :  { %3009 = vmatpush3.msra.mxu0 %v3515_v49 }
 0xbab   :  { %3024 = vmatprep.subr.mxu0 %v3345_v0 }
 0xbfb   :  { %v1286_v4 = vpop.f32.mrf.mxu1 }
 0xbfc   :  { %v1287_v55 = vadd.f32 %v3578_v21, %v1286_v4 }
 0xbfd   :  { %v2979_v30 = vpop.f32.mrf.mxu1 }
 0xc03   :  { %v1453_v31 = vpop.f32.mrf.mxu1 }
 0xc04   :  { %v1458_v32 = vrot.slane %v1453_v31, 4  ;;  %v1459_v33 = vrot.slane %v1453_v31, 5 }
 0xc05   :  { %v3001_v34 = vpop.f32.mrf.mxu1 }
 0xc06   :  { %v1462_v35 = vadd.f32 %v1458_v32, %v3456_v16  ;;  %v1463_v36 = vadd.f32 %v1459_v33, %v3454_v15 }
 0xc08   :  { %v1464_v38 = vmul.f32 %v1462_v35, %v3460_v18  ;;  %v1465_v40 = vmul.f32 %v1463_v36, %v3460_v18  ;;  %v3816_v35 = vld [vmem:[%s4094_s2 + $0x18] sm:$0xff]  ;;  %v3825_v36 = vld [vmem:[%s4094_s2 + $0x10] sm:$0xff] }
 0xc0a   :  { %3189 = vtanh.f32 %v1464_v38 }
 0xc0b   :  { %3191 = vtanh.f32 %v1465_v40 }
 0xc17   :  { %v3190_v50 = vpop.eup %3189 }
 0xc18   :  { %v3192_v51 = vpop.eup %3191  ;;  %v1468_v53 = vmul.f32 %v3190_v50, %v3460_v18 }
 0xc19   :  { %v1469_v39 = vmul.f32 %v3192_v51, %v3460_v18 }
 0xc1a   :  { %v1470_v42 = vadd.f32 %v1468_v53, %v3468_v28 }
 0xc1b   :  { %v1471_v54 = vadd.f32 %v1469_v39, %v3468_v28 }
 0xc1c   :  { %1482 = vrot.lane.b32.xlu0 %v1470_v42, %s3348_s3  ;;  %v1478_v58 = vmul.f32 %v1474_v14, %v1470_v42 }
 0xc1d   :  { %1484 = vrot.lane.b32.xlu1 %v1471_v54, %s3348_s3  ;;  %v1479_v19 = vmul.f32 %v1475_v57, %v1471_v54 }
 0xc63   :  { %v1361_v56 = vpop.f32.mrf.mxu0 }
 0xc64   :  { %v1365_v59 = vadd.f32 %v1361_v56, %v1287_v55 }
 0xc65   :  { %v2990_v61 = vpop.f32.mrf.mxu0 }
 0xc66   :  { %v1366_v62 = vmul.f32 %v1365_v59, %v3460_v18 }
 0xc68   :  { %3193 = vtanh.f32 %v1366_v62 }
 0xc75   :  { %v3194_v41 = vpop.eup %3193 }
 0xc76   :  { %v1368_v37 = vmul.f32 %v3194_v41, %v3460_v18 }
 0xc78   :  { %v1369_v63 = vadd.f32 %v1368_v37, %v3468_v28 }
 0xc7a   :  { %1372 = vrot.lane.b32.xlu0 %v1369_v63, %s3348_s3  ;;  %v1370_v10 = vmul.f32 %v1369_v63, %v3736_v60 }
 0xc8e   :  { %v1483_v3 = vpop.permute.xlu0 %1482 }
 0xc8f   :  { %v1488_v5 = vmul.f32 %v1483_v3, %v1470_v42  ;;  %v1485_v6 = vpop.permute.xlu1 %1484 }
 0xc90   :  { %v1489_v9 = vmul.f32 %v1485_v6, %v1471_v54 }
 0xc91   :  { %1492 = vrot.lane.b32.xlu1 %v1488_v5, %s3349_s12 }
 0xc92   :  { %1494 = vrot.lane.b32.xlu0 %v1489_v9, %s3349_s12 }
 0xcec   :  { %v1373_v11 = vpop.permute.xlu0 %1372 }
 0xced   :  { %v1375_v13 = vmul.f32 %v1373_v11, %v1369_v63 }
 0xcef   :  { %1377 = vrot.lane.b32.xlu1 %v1375_v13, %s3349_s12 }
 0xd03   :  { %v1493_v17 = vpop.permute.xlu1 %1492 }
 0xd04   :  { %v3796_v20 = vadd.f32 %v1493_v17, %v1478_v58  ;;  %v1495_v22 = vpop.permute.xlu0 %1494 }
 0xd05   :  { %v3798_v23 = vadd.f32 %v1495_v22, %v1479_v19 }
 0xd06   :  { %3195 = vtanh.f32 %v3796_v20  ;;  %v1775_v13 = vrot.slane %v3796_v20, 7 }
 0xd07   :  { %3197 = vtanh.f32 %v3798_v23  ;;  %v1776_v14 = vrot.slane %v3798_v23, 7 }
 0xd13   :  { %v3196_v24 = vpop.eup %3195 }
 0xd14   :  { %v3198_v25 = vpop.eup %3197  ;;  %1504 = vrot.lane.b32.xlu0 %v3196_v24, %s3348_s3 }
 0xd15   :  { %1506 = vrot.lane.b32.xlu1 %v3198_v25, %s3348_s3 }
 0xd61   :  { %v1378_v12 = vpop.permute.xlu1 %1377 }
 0xd62   :  { %v3805_v26 = vadd.f32 %v1378_v12, %v1370_v10 }
 0xd64   :  { %3199 = vtanh.f32 %v3805_v26 }
 0xd71   :  { %v3200_v27 = vpop.eup %3199 }
 0xd72   :  { %1383 = vrot.lane.b32.xlu0 %v3200_v27, %s3348_s3 }
 0xd86   :  { %v1505_v1 = vpop.permute.xlu0 %1504 }
 0xd87   :  { %v1507_v29 = vpop.permute.xlu1 %1506  ;;  %v1510_v2 = vmul.f32 %v1505_v1, %v1470_v42 }
 0xd88   :  { %v1511_v4 = vmul.f32 %v1507_v29, %v1471_v54 }
 0xd89   :  { %v1514_v30 = vrot.slane %v1510_v2, 4 }
 0xd8a   :  { %v1515_v31 = vrot.slane %v1511_v4, 3 }
 0xd8c   :  { %v1516_v32 = vsel %vm318_vm5, %v1515_v31, %v1514_v30 }
 0xd8d   :  { %1517 = vrot.lane.b32.xlu1 %v1516_v32, %s3349_s12 }
 0xde4   :  { %v1384_v33 = vpop.permute.xlu0 %1383 }
 0xde5   :  { %v1386_v60 = vmul.f32 %v1384_v33, %v1369_v63 }
 0xde7   :  { %1592 = vrot.lane.b32.xlu0 %v1386_v60, %s3349_s12 }
 0xdff   :  { %v1518_v34 = vpop.permute.xlu1 %1517 }
 0xe00   :  { %3011 = vmatmul.mubr.msk.f32.vlgmr.msra.gmra.mxu0 %vm193_vm6, %v1518_v34 }
 0xe01   :  { %3025 = vmatpush3.msra.mxu0 %v3816_v35  ;;  %3032 = vmatprep.mubr.msk.f32.mxu0 %vm3346_vm0, %v3345_v0 }
 0xe02   :  { %3026 = vmatprep.subr.mxu0 %v3345_v0 }
 0xe03   :  { %3027 = vmatpush3.msra.mxu0 %v3825_v36 }
 0xe04   :  { %3028 = vmatprep.subr.mxu0 %v3345_v0 }
 0xe05   :  { %3029 = vmatpush3.msra.mxu0 %v3429_v7 }
 0xe06   :  { %3030 = vmatprep.subr.mxu0 %v3345_v0 }
 0xe07   :  { %3031 = vmatpush3.msra.mxu0 %v3435_v8 }
 0xe08   :  { %3033 = vmatmul.mubr.msk.f32.vlgmr.msra.gmra.mxu0 %vm193_vm6, %v1518_v34  ;;  %3046 = vmatprep.subr.mxu0 %v3345_v0  ;;  %v3901_v34 = vld [vmem:[%s4094_s2 + $0x8] sm:$0xff] }
 0xe09   :  { %3047 = vmatpush3.msra.mxu0 %v3494_v45  ;;  %3054 = vmatprep.mubr.msk.f32.mxu0 %vm3346_vm0, %v3345_v0 }
 0xe0a   :  { %3048 = vmatprep.subr.mxu0 %v3345_v0 }
 0xe0b   :  { %3049 = vmatpush3.msra.mxu0 %v3498_v46 }
 0xe0c   :  { %3050 = vmatprep.subr.mxu0 %v3345_v0 }
 0xe0d   :  { %3051 = vmatpush3.msra.mxu0 %v3507_v48 }
 0xe0e   :  { %3052 = vmatprep.subr.mxu0 %v3345_v0 }
 0xe0f   :  { %3053 = vmatpush3.msra.mxu0 %v3526_v52 }
 0xe10   :  { %3068 = vmatprep.subr.mxu0 %v3345_v0 }
 0xe59   :  { %v1593_v7 = vpop.permute.xlu0 %1592 }
 0xe5a   :  { %3022 = vmatmul.mubr.msk.f32.vlgmr.msra.gmra.mxu1 %vm193_vm6, %v1593_v7  ;;  %v3908_v7 = vld [vmem:[%s4094_s2] sm:$0xff] }
 0xe5b   :  { %3036 = vmatpush3.msra.mxu1 %v3487_v43  ;;  %3043 = vmatprep.mubr.msk.f32.mxu1 %vm3346_vm0, %v3345_v0 }
 0xe5c   :  { %3037 = vmatprep.subr.mxu1 %v3345_v0 }
 0xe5d   :  { %3038 = vmatpush3.msra.mxu1 %v3492_v44 }
 0xe5e   :  { %3039 = vmatprep.subr.mxu1 %v3345_v0 }
 0xe5f   :  { %3040 = vmatpush3.msra.mxu1 %v3504_v47 }
 0xe60   :  { %3041 = vmatprep.subr.mxu1 %v3345_v0 }
 0xe61   :  { %3042 = vmatpush3.msra.mxu1 %v3515_v49 }
 0xe62   :  { %3057 = vmatprep.subr.mxu1 %v3345_v0 }
 0xec0   :  { %v1587_v8 = vpop.f32.mrf.mxu0 }
 0xec1   :  { %v1588_v54 = vadd.f32 %v3578_v21, %v1587_v8  ;;  %v3913_v8 = vld [vmem:[#allocation7 + $0x18] sm:$0xff] }
 0xec2   :  { %v3012_v45 = vpop.f32.mrf.mxu0 }
 0xec3   :  { %v3919_v45 = vld [vmem:[#allocation7 + $0x10] sm:$0xff] }
 0xec8   :  { %v1754_v43 = vpop.f32.mrf.mxu0 }
 0xec9   :  { %v1759_v46 = vrot.slane %v1754_v43, 3  ;;  %v1760_v48 = vrot.slane %v1754_v43, 4  ;;  %v3923_v43 = vld [vmem:[#allocation7 + $0x8] sm:$0xff] }
 0xeca   :  { %v3034_v52 = vpop.f32.mrf.mxu0 }
 0xecb   :  { %v1763_v38 = vadd.f32 %v1759_v46, %v3456_v16  ;;  %v1764_v44 = vadd.f32 %v1760_v48, %v3454_v15  ;;  %v3927_v46 = vld [vmem:[#allocation7] sm:$0xff]  ;;  %v3935_v52 = vld [vmem:[%s4096_s4 + $0x18] sm:$0xff] }
 0xecd   :  { %v1765_v40 = vmul.f32 %v1763_v38, %v3460_v18  ;;  %v1766_v47 = vmul.f32 %v1764_v44, %v3460_v18  ;;  %v3944_v38 = vld [vmem:[%s4096_s4 + $0x10] sm:$0xff]  ;;  %v3951_v44 = vld [vmem:[%s4096_s4 + $0x8] sm:$0xff] }
 0xecf   :  { %3201 = vtanh.f32 %v1765_v40  ;;  %v3958_v40 = vld [vmem:[%s4096_s4] sm:$0xff] }
 0xed0   :  { %3203 = vtanh.f32 %v1766_v47 }
 0xedc   :  { %v3202_v50 = vpop.eup %3201 }
 0xedd   :  { %v3204_v49 = vpop.eup %3203  ;;  %v1769_v51 = vmul.f32 %v3202_v50, %v3460_v18 }
 0xede   :  { %v1770_v53 = vmul.f32 %v3204_v49, %v3460_v18 }
 0xedf   :  { %v1771_v39 = vadd.f32 %v1769_v51, %v3468_v28 }
 0xee0   :  { %v1772_v42 = vadd.f32 %v1770_v53, %v3468_v28 }
 0xee1   :  { %1783 = vrot.lane.b32.xlu1 %v1771_v39, %s3348_s3  ;;  %v1779_v57 = vmul.f32 %v1775_v13, %v1771_v39 }
 0xee2   :  { %1785 = vrot.lane.b32.xlu0 %v1772_v42, %s3348_s3  ;;  %v1780_v17 = vmul.f32 %v1776_v14, %v1772_v42 }
 0xf1a   :  { %v1662_v55 = vpop.f32.mrf.mxu1 }
 0xf1b   :  { %v1666_v56 = vadd.f32 %v1662_v55, %v1588_v54 }
 0xf1c   :  { %v3023_v59 = vpop.f32.mrf.mxu1 }
 0xf1d   :  { %v1667_v61 = vmul.f32 %v1666_v56, %v3460_v18 }
 0xf1f   :  { %3205 = vtanh.f32 %v1667_v61 }
 0xf2c   :  { %v3206_v62 = vpop.eup %3205 }
 0xf2d   :  { %v1669_v41 = vmul.f32 %v3206_v62, %v3460_v18 }
 0xf2f   :  { %v1670_v37 = vadd.f32 %v1669_v41, %v3468_v28 }
 0xf31   :  { %1673 = vrot.lane.b32.xlu1 %v1670_v37, %s3348_s3  ;;  %v1671_v20 = vmul.f32 %v1670_v37, %v3805_v26 }
 0xf53   :  { %v1784_v63 = vpop.permute.xlu1 %1783 }
 0xf54   :  { %v1786_v3 = vpop.permute.xlu0 %1785  ;;  %v1789_v5 = vmul.f32 %v1784_v63, %v1771_v39 }
 0xf55   :  { %v1790_v6 = vmul.f32 %v1786_v3, %v1772_v42 }
 0xf56   :  { %1793 = vrot.lane.b32.xlu0 %v1789_v5, %s3349_s12 }
 0xf57   :  { %1795 = vrot.lane.b32.xlu1 %v1790_v6, %s3349_s12 }
 0xfa3   :  { %v1674_v9 = vpop.permute.xlu1 %1673 }
 0xfa4   :  { %v1676_v11 = vmul.f32 %v1674_v9, %v1670_v37 }
 0xfa6   :  { %1678 = vrot.lane.b32.xlu0 %v1676_v11, %s3349_s12 }
 0xfc8   :  { %v1794_v58 = vpop.permute.xlu0 %1793 }
 0xfc9   :  { %v3875_v19 = vadd.f32 %v1794_v58, %v1779_v57  ;;  %v1796_v22 = vpop.permute.xlu1 %1795 }
 0xfca   :  { %v3877_v24 = vadd.f32 %v1796_v22, %v1780_v17 }
 0xfcb   :  { %3207 = vtanh.f32 %v3875_v19 }
 0xfcc   :  { %3209 = vtanh.f32 %v3877_v24 }
 0xfd8   :  { %v3208_v25 = vpop.eup %3207 }
 0xfd9   :  { %v3210_v10 = vpop.eup %3209  ;;  %1805 = vrot.lane.b32.xlu1 %v3208_v25, %s3348_s3 }
 0xfda   :  { %1807 = vrot.lane.b32.xlu0 %v3210_v10, %s3348_s3 }
0x1018   :  { %v1679_v23 = vpop.permute.xlu0 %1678 }
0x1019   :  { %v3884_v12 = vadd.f32 %v1679_v23, %v1671_v20  ;;  %v2076_v20 = vrot.slane %v3875_v19, 7  ;;  %v2077_v23 = vrot.slane %v3877_v24, 7 }
0x101b   :  { %3211 = vtanh.f32 %v3884_v12 }
0x1028   :  { %v3212_v27 = vpop.eup %3211 }
0x1029   :  { %1684 = vrot.lane.b32.xlu1 %v3212_v27, %s3348_s3 }
0x104b   :  { %v1806_v1 = vpop.permute.xlu1 %1805 }
0x104c   :  { %v1808_v29 = vpop.permute.xlu0 %1807  ;;  %v1811_v2 = vmul.f32 %v1806_v1, %v1771_v39 }
0x104d   :  { %v1812_v4 = vmul.f32 %v1808_v29, %v1772_v42 }
0x104e   :  { %v1815_v30 = vrot.slane %v1811_v2, 5 }
0x104f   :  { %v1816_v31 = vrot.slane %v1812_v4, 4 }
0x1051   :  { %v1817_v32 = vsel %vm318_vm5, %v1816_v31, %v1815_v30 }
0x1052   :  { %1818 = vrot.lane.b32.xlu0 %v1817_v32, %s3349_s12 }
0x109b   :  { %v1685_v33 = vpop.permute.xlu1 %1684 }
0x109c   :  { %v1687_v26 = vmul.f32 %v1685_v33, %v1670_v37 }
0x109e   :  { %1893 = vrot.lane.b32.xlu1 %v1687_v26, %s3349_s12 }
0x10c4   :  { %v1819_v60 = vpop.permute.xlu0 %1818 }
0x10c5   :  { %3044 = vmatmul.mubr.msk.f32.vlgmr.msra.gmra.mxu1 %vm193_vm6, %v1819_v60 }
0x10c6   :  { %3058 = vmatpush3.msra.mxu1 %v3816_v35  ;;  %3065 = vmatprep.mubr.msk.f32.mxu1 %vm3346_vm0, %v3345_v0 }
0x10c7   :  { %3059 = vmatprep.subr.mxu1 %v3345_v0 }
0x10c8   :  { %3060 = vmatpush3.msra.mxu1 %v3825_v36 }
0x10c9   :  { %3061 = vmatprep.subr.mxu1 %v3345_v0 }
0x10ca   :  { %3062 = vmatpush3.msra.mxu1 %v3901_v34 }
0x10cb   :  { %3063 = vmatprep.subr.mxu1 %v3345_v0 }
0x10cc   :  { %3064 = vmatpush3.msra.mxu1 %v3908_v7 }
0x10cd   :  { %3066 = vmatmul.mubr.msk.f32.vlgmr.msra.gmra.mxu1 %vm193_vm6, %v1819_v60  ;;  %3079 = vmatprep.subr.mxu1 %v3345_v0 }
0x10ce   :  { %3080 = vmatpush3.msra.mxu1 %v3913_v8  ;;  %3087 = vmatprep.mubr.msk.f32.mxu1 %vm3346_vm0, %v3345_v0 }
0x10cf   :  { %3081 = vmatprep.subr.mxu1 %v3345_v0 }
0x10d0   :  { %3082 = vmatpush3.msra.mxu1 %v3919_v45 }
0x10d1   :  { %3083 = vmatprep.subr.mxu1 %v3345_v0 }
0x10d2   :  { %3084 = vmatpush3.msra.mxu1 %v3923_v43 }
0x10d3   :  { %3085 = vmatprep.subr.mxu1 %v3345_v0 }
0x10d4   :  { %3086 = vmatpush3.msra.mxu1 %v3927_v46 }
0x10d5   :  { %3101 = vmatprep.subr.mxu1 %v3345_v0 }
0x1110   :  { %v1894_v48 = vpop.permute.xlu1 %1893 }
0x1111   :  { %3055 = vmatmul.mubr.msk.f32.vlgmr.msra.gmra.mxu0 %vm193_vm6, %v1894_v48 }
0x1112   :  { %3069 = vmatpush3.msra.mxu0 %v3935_v52  ;;  %3076 = vmatprep.mubr.msk.f32.mxu0 %vm3346_vm0, %v3345_v0 }
0x1113   :  { %3070 = vmatprep.subr.mxu0 %v3345_v0 }
0x1114   :  { %3071 = vmatpush3.msra.mxu0 %v3944_v38 }
0x1115   :  { %3072 = vmatprep.subr.mxu0 %v3345_v0 }
0x1116   :  { %3073 = vmatpush3.msra.mxu0 %v3951_v44 }
0x1117   :  { %3074 = vmatprep.subr.mxu0 %v3345_v0 }
0x1118   :  { %3075 = vmatpush3.msra.mxu0 %v3958_v40 }
0x1119   :  { %3090 = vmatprep.subr.mxu0 %v3345_v0 }
0x1185   :  { %v1888_v47 = vpop.f32.mrf.mxu1 }
0x1186   :  { %v1889_v3 = vadd.f32 %v3578_v21, %v1888_v47 }
0x1187   :  { %v3045_v50 = vpop.f32.mrf.mxu1 }
0x118d   :  { %v2055_v49 = vpop.f32.mrf.mxu1 }
0x118e   :  { %v2060_v51 = vrot.slane %v2055_v49, 2  ;;  %v2061_v53 = vrot.slane %v2055_v49, 3 }
0x118f   :  { %v3067_v39 = vpop.f32.mrf.mxu1 }
0x1190   :  { %v2064_v42 = vadd.f32 %v2060_v51, %v3456_v16  ;;  %v2065_v54 = vadd.f32 %v2061_v53, %v3454_v15 }
0x1192   :  { %v2066_v55 = vmul.f32 %v2064_v42, %v3460_v18  ;;  %v2067_v56 = vmul.f32 %v2065_v54, %v3460_v18 }
0x1194   :  { %3213 = vtanh.f32 %v2066_v55 }
0x1195   :  { %3215 = vtanh.f32 %v2067_v56 }
0x11a1   :  { %v3214_v59 = vpop.eup %3213 }
0x11a2   :  { %v3216_v61 = vpop.eup %3215  ;;  %v2070_v62 = vmul.f32 %v3214_v59, %v3460_v18 }
0x11a3   :  { %v2071_v41 = vmul.f32 %v3216_v61, %v3460_v18 }
0x11a4   :  { %v2072_v37 = vadd.f32 %v2070_v62, %v3468_v28 }
0x11a5   :  { %v2073_v63 = vadd.f32 %v2071_v41, %v3468_v28 }
0x11a6   :  { %2084 = vrot.lane.b32.xlu0 %v2072_v37, %s3348_s3  ;;  %v2080_v27 = vmul.f32 %v2076_v20, %v2072_v37 }
0x11a7   :  { %2086 = vrot.lane.b32.xlu1 %v2073_v63, %s3348_s3  ;;  %v2081_v29 = vmul.f32 %v2077_v23, %v2073_v63 }
0x11d1   :  { %v1963_v5 = vpop.f32.mrf.mxu0 }
0x11d2   :  { %v1967_v6 = vadd.f32 %v1963_v5, %v1889_v3 }
0x11d3   :  { %v3056_v9 = vpop.f32.mrf.mxu0 }
0x11d4   :  { %v1968_v11 = vmul.f32 %v1967_v6, %v3460_v18 }
0x11d6   :  { %3217 = vtanh.f32 %v1968_v11 }
0x11e3   :  { %v3218_v13 = vpop.eup %3217 }
0x11e4   :  { %v1970_v14 = vmul.f32 %v3218_v13, %v3460_v18 }
0x11e6   :  { %v1971_v57 = vadd.f32 %v1970_v14, %v3468_v28 }
0x11e8   :  { %1974 = vrot.lane.b32.xlu0 %v1971_v57, %s3348_s3  ;;  %v1972_v19 = vmul.f32 %v1971_v57, %v3884_v12 }
0x1218   :  { %v2085_v58 = vpop.permute.xlu0 %2084 }
0x1219   :  { %v2090_v17 = vmul.f32 %v2085_v58, %v2072_v37  ;;  %v2087_v22 = vpop.permute.xlu1 %2086 }
0x121a   :  { %v2091_v25 = vmul.f32 %v2087_v22, %v2073_v63 }
0x121b   :  { %2094 = vrot.lane.b32.xlu1 %v2090_v17, %s3349_s12 }
0x121c   :  { %2096 = vrot.lane.b32.xlu0 %v2091_v25, %s3349_s12 }
0x125a   :  { %v1975_v21 = vpop.permute.xlu0 %1974 }
0x125b   :  { %v1977_v10 = vmul.f32 %v1975_v21, %v1971_v57 }
0x125d   :  { %1979 = vrot.lane.b32.xlu1 %v1977_v10, %s3349_s12 }
0x128d   :  { %v2095_v1 = vpop.permute.xlu1 %2094 }
0x128e   :  { %v3982_v2 = vadd.f32 %v2095_v1, %v2080_v27  ;;  %v2097_v4 = vpop.permute.xlu0 %2096 }
0x128f   :  { %v3984_v30 = vadd.f32 %v2097_v4, %v2081_v29 }
0x1290   :  { %3219 = vtanh.f32 %v3982_v2  ;;  %v2377_v17 = vrot.slane %v3982_v2, 7 }
0x1291   :  { %3221 = vtanh.f32 %v3984_v30  ;;  %v2378_v22 = vrot.slane %v3984_v30, 7 }
0x129d   :  { %v3220_v31 = vpop.eup %3219 }
0x129e   :  { %v3222_v32 = vpop.eup %3221  ;;  %2106 = vrot.lane.b32.xlu0 %v3220_v31, %s3348_s3 }
0x129f   :  { %2108 = vrot.lane.b32.xlu1 %v3222_v32, %s3348_s3 }
0x12cf   :  { %v1980_v24 = vpop.permute.xlu1 %1979 }
0x12d0   :  { %v3991_v33 = vadd.f32 %v1980_v24, %v1972_v19 }
0x12d2   :  { %3223 = vtanh.f32 %v3991_v33 }
0x12df   :  { %v3224_v26 = vpop.eup %3223 }
0x12e0   :  { %1985 = vrot.lane.b32.xlu0 %v3224_v26, %s3348_s3 }
0x1310   :  { %v2107_v60 = vpop.permute.xlu0 %2106 }
0x1311   :  { %v2109_v48 = vpop.permute.xlu1 %2108  ;;  %v2112_v47 = vmul.f32 %v2107_v60, %v2072_v37 }
0x1312   :  { %v2113_v50 = vmul.f32 %v2109_v48, %v2073_v63 }
0x1313   :  { %v2116_v49 = vrot.slane %v2112_v47, 6 }
0x1314   :  { %v2117_v51 = vrot.slane %v2113_v50, 5 }
0x1316   :  { %v2118_v53 = vsel %vm318_vm5, %v2117_v51, %v2116_v49 }
0x1317   :  { %2119 = vrot.lane.b32.xlu1 %v2118_v53, %s3349_s12 }
0x1352   :  { %v1986_v39 = vpop.permute.xlu0 %1985 }
0x1353   :  { %v1988_v12 = vmul.f32 %v1986_v39, %v1971_v57 }
0x1355   :  { %2194 = vrot.lane.b32.xlu0 %v1988_v12, %s3349_s12 }
0x1389   :  { %v2120_v42 = vpop.permute.xlu1 %2119 }
0x138a   :  { %3077 = vmatmul.mubr.msk.f32.vlgmr.msra.gmra.mxu0 %vm193_vm6, %v2120_v42 }
0x138b   :  { %3091 = vmatpush3.msra.mxu0 %v3816_v35  ;;  %3098 = vmatprep.mubr.msk.f32.mxu0 %vm3346_vm0, %v3345_v0 }
0x138c   :  { %3092 = vmatprep.subr.mxu0 %v3345_v0 }
0x138d   :  { %3093 = vmatpush3.msra.mxu0 %v3825_v36 }
0x138e   :  { %3094 = vmatprep.subr.mxu0 %v3345_v0 }
0x138f   :  { %3095 = vmatpush3.msra.mxu0 %v3901_v34 }
0x1390   :  { %3096 = vmatprep.subr.mxu0 %v3345_v0 }
0x1391   :  { %3097 = vmatpush3.msra.mxu0 %v3908_v7 }
0x1392   :  { %3099 = vmatmul.mubr.msk.f32.vlgmr.msra.gmra.mxu0 %vm193_vm6, %v2120_v42  ;;  %3112 = vmatprep.subr.mxu0 %v3345_v0 }
0x1393   :  { %3113 = vmatpush3.msra.mxu0 %v3913_v8  ;;  %3120 = vmatprep.mubr.msk.f32.mxu0 %vm3346_vm0, %v3345_v0 }
0x1394   :  { %3114 = vmatprep.subr.mxu0 %v3345_v0 }
0x1395   :  { %3115 = vmatpush3.msra.mxu0 %v3919_v45 }
0x1396   :  { %3116 = vmatprep.subr.mxu0 %v3345_v0 }
0x1397   :  { %3117 = vmatpush3.msra.mxu0 %v3923_v43 }
0x1398   :  { %3118 = vmatprep.subr.mxu0 %v3345_v0 }
0x1399   :  { %3119 = vmatpush3.msra.mxu0 %v3927_v46 }
0x13c7   :  { %v2195_v35 = vpop.permute.xlu0 %2194 }
0x13c8   :  { %3088 = vmatmul.mubr.msk.f32.vlgmr.msra.gmra.mxu1 %vm193_vm6, %v2195_v35 }
0x13c9   :  { %3102 = vmatpush3.msra.mxu1 %v3935_v52  ;;  %3109 = vmatprep.mubr.msk.f32.mxu1 %vm3346_vm0, %v3345_v0 }
0x13ca   :  { %3103 = vmatprep.subr.mxu1 %v3345_v0 }
0x13cb   :  { %3104 = vmatpush3.msra.mxu1 %v3944_v38 }
0x13cc   :  { %3105 = vmatprep.subr.mxu1 %v3345_v0 }
0x13cd   :  { %3106 = vmatpush3.msra.mxu1 %v3951_v44 }
0x13ce   :  { %3107 = vmatprep.subr.mxu1 %v3345_v0 }
0x13cf   :  { %3108 = vmatpush3.msra.mxu1 %v3958_v40 }
0x13d0   :  { %3123 = vmatprep.subr.mxu1 %v3345_v0 }
0x144a   :  { %v2189_v36 = vpop.f32.mrf.mxu0 }
0x144c   :  { %v3078_v34 = vpop.f32.mrf.mxu0 }
0x1452   :  { %v2356_v7 = vpop.f32.mrf.mxu0 }
0x1453   :  { %v2361_v8 = vrot.slane %v2356_v7, 1  ;;  %v2362_v45 = vrot.slane %v2356_v7, 2 }
0x1454   :  { %v3100_v43 = vpop.f32.mrf.mxu0 }
0x1455   :  { %v2365_v46 = vadd.f32 %v2361_v8, %v3456_v16  ;;  %v2366_v52 = vadd.f32 %v2362_v45, %v3454_v15  ;;  %v3253_v15 = vld [vmem:[%s4098_s6] ss:$0 sm:$0xff] }
0x1456   :  { %v2190_v16 = vadd.f32 %v3253_v15, %v2189_v36 }
0x1457   :  { %v2367_v38 = vmul.f32 %v2365_v46, %v3460_v18  ;;  %v2368_v44 = vmul.f32 %v2366_v52, %v3460_v18 }
0x1459   :  { %3225 = vtanh.f32 %v2367_v38 }
0x145a   :  { %3227 = vtanh.f32 %v2368_v44 }
0x1466   :  { %v3226_v54 = vpop.eup %3225 }
0x1467   :  { %v3228_v40 = vpop.eup %3227  ;;  %v2371_v55 = vmul.f32 %v3226_v54, %v3460_v18  ;;  %v2594_v54 = vld [vmem:[%s4099_s7 + $0x18] sm:$0xff] }
0x1468   :  { %v2372_v56 = vmul.f32 %v3228_v40, %v3460_v18  ;;  %v2591_v40 = vld [vmem:[%s4099_s7] sm:$0xff] }
0x1469   :  { %v2373_v59 = vadd.f32 %v2371_v55, %v3468_v28 }
0x146a   :  { %v2374_v61 = vadd.f32 %v2372_v56, %v3468_v28 }
0x146b   :  { %2385 = vrot.lane.b32.xlu1 %v2373_v59, %s3348_s3  ;;  %v2381_v25 = vmul.f32 %v2377_v17, %v2373_v59 }
0x146c   :  { %2387 = vrot.lane.b32.xlu0 %v2374_v61, %s3348_s3  ;;  %v2382_v10 = vmul.f32 %v2378_v22, %v2374_v61 }
0x1488   :  { %v2264_v62 = vpop.f32.mrf.mxu1 }
0x1489   :  { %v2268_v41 = vadd.f32 %v2264_v62, %v2190_v16 }
0x148a   :  { %v3089_v37 = vpop.f32.mrf.mxu1 }
0x148b   :  { %v2269_v63 = vmul.f32 %v2268_v41, %v3460_v18 }
0x148d   :  { %3229 = vtanh.f32 %v2269_v63 }
0x149a   :  { %v3230_v3 = vpop.eup %3229 }
0x149b   :  { %v2271_v5 = vmul.f32 %v3230_v3, %v3460_v18 }
0x149d   :  { %v2272_v6 = vadd.f32 %v2271_v5, %v3468_v28 }
0x149f   :  { %2275 = vrot.lane.b32.xlu1 %v2272_v6, %s3348_s3  ;;  %v2273_v4 = vmul.f32 %v2272_v6, %v3991_v33 }
0x14dd   :  { %v2386_v9 = vpop.permute.xlu1 %2385 }
0x14de   :  { %v2388_v11 = vpop.permute.xlu0 %2387  ;;  %v2391_v13 = vmul.f32 %v2386_v9, %v2373_v59 }
0x14df   :  { %v2392_v14 = vmul.f32 %v2388_v11, %v2374_v61 }
0x14e0   :  { %2395 = vrot.lane.b32.xlu0 %v2391_v13, %s3349_s12 }
0x14e1   :  { %2397 = vrot.lane.b32.xlu1 %v2392_v14, %s3349_s12 }
0x1511   :  { %v2276_v57 = vpop.permute.xlu1 %2275 }
0x1512   :  { %v2278_v58 = vmul.f32 %v2276_v57, %v2272_v6 }
0x1514   :  { %2280 = vrot.lane.b32.xlu0 %v2278_v58, %s3349_s12 }
0x1552   :  { %v2396_v21 = vpop.permute.xlu0 %2395 }
0x1553   :  { %v2401_v20 = vadd.f32 %v2396_v21, %v2381_v25  ;;  %v2398_v23 = vpop.permute.xlu1 %2397 }
0x1554   :  { %v2402_v27 = vadd.f32 %v2398_v23, %v2382_v10 }
0x1555   :  { %3231 = vtanh.f32 %v2401_v20 }
0x1556   :  { %3233 = vtanh.f32 %v2402_v27 }
0x1562   :  { %v3232_v1 = vpop.eup %3231 }
0x1563   :  { %v3234_v29 = vpop.eup %3233  ;;  %2407 = vrot.lane.b32.xlu1 %v3232_v1, %s3348_s3 }
0x1564   :  { %2409 = vrot.lane.b32.xlu0 %v3234_v29, %s3348_s3 }
0x1586   :  { %v2281_v31 = vpop.permute.xlu0 %2280 }
0x1587   :  { %v2283_v2 = vadd.f32 %v2281_v31, %v2273_v4 }
0x1589   :  { %3235 = vtanh.f32 %v2283_v2 }
0x1596   :  { %v3236_v30 = vpop.eup %3235 }
0x1597   :  { %2286 = vrot.lane.b32.xlu1 %v3236_v30, %s3348_s3 }
0x15d5   :  { %v2408_v32 = vpop.permute.xlu1 %2407 }
0x15d6   :  { %v2410_v19 = vpop.permute.xlu0 %2409  ;;  %v2413_v24 = vmul.f32 %v2408_v32, %v2373_v59 }
0x15d7   :  { %v2414_v26 = vmul.f32 %v2410_v19, %v2374_v61 }
0x15d8   :  { %v2417_v60 = vrot.slane %v2413_v24, 7 }
0x15d9   :  { %v2418_v48 = vrot.slane %v2414_v26, 6 }
0x15db   :  { %v2419_v47 = vsel %vm318_vm5, %v2418_v48, %v2417_v60 }
0x15dc   :  { %2420 = vrot.lane.b32.xlu0 %v2419_v47, %s3349_s12 }
0x1609   :  { %v2287_v50 = vpop.permute.xlu1 %2286 }
0x160a   :  { %v2289_v49 = vmul.f32 %v2287_v50, %v2272_v6 }
0x160c   :  { %2495 = vrot.lane.b32.xlu1 %v2289_v49, %s3349_s12 }
0x164e   :  { %v2421_v33 = vpop.permute.xlu0 %2420 }
0x164f   :  { %3110 = vmatmul.mubr.msk.f32.vlgmr.msra.gmra.mxu1 %vm193_vm6, %v2421_v33 }
0x1650   :  { %3131 = vmatprep.mubr.msk.f32.mxu1 %vm3346_vm0, %v3345_v0  ;;  %3124 = vmatpush3.msra.mxu1 %v2594_v54 }
0x1651   :  { %3125 = vmatprep.subr.mxu1 %v3345_v0 }
0x167e   :  { %v2496_v51 = vpop.permute.xlu1 %2495 }
0x167f   :  { %3121 = vmatmul.mubr.msk.f32.vlgmr.msra.gmra.mxu0 %vm193_vm6, %v2496_v51 }
0x170f   :  { %v2490_v53 = vpop.f32.mrf.mxu1 }
0x1710   :  { %v2491_v12 = vadd.f32 %v3253_v15, %v2490_v53  ;;  %v2721_v15 = vld [vmem:[%s4100_s8] ss:$0 sm:$0xff] }
0x1711   :  { %v3111_v39 = vpop.f32.mrf.mxu1 }
0x173f   :  { %v2565_v42 = vpop.f32.mrf.mxu0 }
0x1740   :  { %v2569_v35 = vadd.f32 %v2565_v42, %v2491_v12 }
0x1741   :  { %v3122_v36 = vpop.f32.mrf.mxu0 }
0x1742   :  { %v2570_v34 = vmul.f32 %v2569_v35, %v3460_v18 }
0x1744   :  { %3237 = vtanh.f32 %v2570_v34 }
0x1751   :  { %v3238_v7 = vpop.eup %3237 }
0x1752   :  { %v2572_v8 = vmul.f32 %v3238_v7, %v3460_v18  ;;  %v2593_v18 = vld [vmem:[%s4099_s7 + $0x10] sm:$0xff] }
0x1753   :  { %3126 = vmatpush3.msra.mxu1 %v2593_v18 }
0x1754   :  { %v2573_v45 = vadd.f32 %v2572_v8, %v3468_v28  ;;  %v2592_v28 = vld [vmem:[%s4099_s7 + $0x8] sm:$0xff]  ;;  %3127 = vmatprep.subr.mxu1 %v3345_v0  ;;  %s2685_s7 = sshll.u32 %s3350_s24, 4  ;;  %s2686_s7 = int_to_ptr.vmem [resolvable:$true] %s2685_s7 }
0x1755   :  { %3128 = vmatpush3.msra.mxu1 %v2592_v28  ;;  %p3319_p2 = scmp.lt.s32.totalorder %s2686_s7, %s2686_s7 }
0x1756   :  { %2576 = vrot.lane.b32.xlu0 %v2573_v45, %s3348_s3  ;;  %v2574_v52 = vmul.f32 %v2573_v45, %v2283_v2  ;;  %3129 = vmatprep.subr.mxu1 %v3345_v0 }
0x1757   :  { %3130 = vmatpush3.msra.mxu1 %v2591_v40 }
0x17c8   :  { %v2577_v43 = vpop.permute.xlu0 %2576 }
0x17c9   :  { %v2579_v46 = vmul.f32 %v2577_v43, %v2573_v45 }
0x17cb   :  { %2581 = vrot.lane.b32.xlu1 %v2579_v46, %s3349_s12 }
0x183d   :  { %v2582_v38 = vpop.permute.xlu1 %2581 }
0x183e   :  { %v2584_v44 = vadd.f32 %v2582_v38, %v2574_v52 }
0x1840   :  { %3239 = vtanh.f32 %v2584_v44 }
0x184d   :  { %v3240_v55 = vpop.eup %3239 }
0x184e   :  { %2587 = vrot.lane.b32.xlu0 %v3240_v55, %s3348_s3  ;;  %s3314_s3 = scalar_lea.vmem %s2686_s7, 32 }
0x184f   :  { %p3315_p1 = scmp.ne.s32.totalorder %s2686_s7, %s3314_s3  ;;  %p3320_p3 = scmp.lt.s32.totalorder %s3314_s3, %s3314_s3 }
0x1851   :  { %p3321_p4 = por %p3320_p3, %p3319_p2 }
0x1853   :  { %p3322_p5 = pnand %p3321_p4, %p3315_p1 }
0x18c0   :  { %v2588_v56 = vpop.permute.xlu0 %2587 }
0x18c1   :  { %v2590_v59 = vmul.f32 %v2588_v56, %v2573_v45 }
0x18c3   :  { %2603 = vrot.lane.b32.xlu1 %v2590_v59, %s3349_s12 }
0x1935   :  { %v2604_v61 = vpop.permute.xlu1 %2603 }
0x1936   :  { %3132 = vmatmul.mubr.msk.f32.vlgmr.msra.gmra.mxu1 %vm193_vm6, %v2604_v61 }
0x19f6   :  { %v2673_v16 = vpop.f32.mrf.mxu1 }
0x19f7   :  { %v2674_v0 = vadd.f32 %v2721_v15, %v2673_v16 }
0x19f8   :  { %v3133_v62 = vpop.f32.mrf.mxu1 }
0x19f9   :  { %2678 = vst.msk [vmem:[#allocation8] sm:$0x3] %vm2677_vm7, %v2674_v0 }
0x19fa   :  { %3325 = shalt.err (!%p3322_p5)
}
0x19fb   :  { %2688 = dma.vmem_to_hbm [thread:$0]  %s2686_s7, 32, %s4101_s9, [#allocation4]  }
0x19fc   :  { %3338 = dma.done.wait [#allocation4], 32  }
0x19fd   :  { %3339 = vsyncadd [#allocation4], 4294967264 }
0x19fe   :  { %2692 = vsyncpa [#allocation3], 1 }
0x19ff   :  { %2693 = vsyncpa [#allocation6], 1 }
0x1a00   :  { %2694 = vsyncpa [#allocation4], 1 }

</bundles_post_ra>
